<compile_context>
chip_gen: v6e
topology: v6e:2x2x1
jax: 0.10.0
libtpu: 0.0.40
codegen_flags: <defaults>
</compile_context>

<pallas_src>
import functools

import jax
import jax.numpy as jnp
import numpy as np
from jax import lax
from jax.experimental import pallas as pl
from jax.experimental.pallas import tpu as pltpu

HIGHEST = jax.lax.Precision.HIGHEST
LANE = 128   # channels are zero-padded to a multiple of this (lane-dense layout)
LPAD = 8     # sublane-aligned left pad of the W axis of the depthwise scratch


def _round_up(x, m):
    return (x + m - 1) // m * m


def _inverted_residual_kernel(
    x_ref,    # (1, H+2, W, Cin_p)       bf16  H zero-padded by 1 row on each side
    w1_ref,   # (Cin_p, Cmid_p)          bf16  1x1 expand weights (BN1 scale folded)
    b1_ref,   # (1, Cmid_p)              f32   BN1 bias
    dw_ref,   # (9, Cmid_p)              f32   3x3 depthwise weights (BN2 scale folded)
    b2_ref,   # (1, Cmid_p)              f32   BN2 bias
    w3_ref,   # (Cmid_p, Cout_p)         bf16  1x1 project weights (BN3 scale folded)
    b3_ref,   # (1, Cout_p)              f32   BN3 bias
    out_ref,  # (1, tile_h, Wo, Cout_p)  f32
    pad_ref,  # scratch (TH_in, W_pad, Cmid_p) bf16: expanded activation + halo
    *, H, W, Wo, tile_h, TH_in, W_pad, Cin_p, Cmid_p, Cout_p,
    stride, use_res_connect,
):
    f32 = jnp.float32
    bf16 = jnp.bfloat16
    h = pl.program_id(1)
    row_step = tile_h * stride
    row0 = pl.multiple_of(h * row_step, row_step)   # first padded-x row of this tile

    # -- Zero the W borders of the scratch once per image: they are never
    #    rewritten afterwards, and the scratch persists across the h sweep. --
    @pl.when(h == 0)
    def _():
        pad_ref[:, 0:LPAD, :] = jnp.zeros((TH_in, LPAD, Cmid_p), bf16)
        pad_ref[:, LPAD + W:W_pad, :] = jnp.zeros(
            (TH_in, W_pad - LPAD - W, Cmid_p), bf16)

    # -- 1x1 expansion conv on the MXU: (TH_in*W, Cin_p) @ (Cin_p, Cmid_p) --
    x_in = x_ref[:, pl.ds(row0, TH_in), :, :]                  # (1,TH_in,W,Cin_p) bf16
    t = jnp.dot(x_in.reshape(TH_in * W, Cin_p), w1_ref[...],
                preferred_element_type=f32)                    # (TH_in*W, Cmid_p) f32
    t = jnp.clip(t + b1_ref[...], 0.0, 6.0)                    # bias + ReLU6
    # Interior store starts at sublane offset LPAD (aligned, lane-dense).
    pad_ref[:, LPAD:LPAD + W, :] = t.astype(bf16).reshape(TH_in, W, Cmid_p)

    # -- Scratch rows that fall on the image's H zero-padding must be true
    #    zeros (the expansion of a zero input row is clip(b1,0,6), not 0). --
    @pl.when(row0 == 0)                                        # tile touches top border
    def _():
        pad_ref[0:1, :, :] = jnp.zeros((1, W_pad, Cmid_p), bf16)

    @pl.when(row0 + TH_in - 1 == H + 1)                        # tile touches bottom border
    def _():
        pad_ref[TH_in - 1:TH_in, :, :] = jnp.zeros((1, W_pad, Cmid_p), bf16)

    # -- 3x3 depthwise conv, evaluated directly at output resolution --
    def tap(dy, dx):
        if stride == 1:
            win = pad_ref[dy:dy + tile_h, LPAD - 1 + dx:LPAD - 1 + dx + Wo, :]
        else:
            # TODO(synk): stride-2 would be faster with a one-time even/odd
            # column de-interleave instead of strided sublane reads.
            win = pad_ref[pl.ds(dy, tile_h, stride=stride),
                          pl.ds(LPAD - 1 + dx, Wo, stride=stride), :]
        return win.astype(f32) * dw_ref[dy * 3 + dx, :]        # per-channel MAC (f32)

    acc = tap(0, 0)                                            # init with first tap
    for k in range(1, 9):
        acc = acc + tap(k // 3, k % 3)
    acc = jnp.clip(acc + b2_ref[...], 0.0, 6.0)                # bias + ReLU6

    # -- 1x1 projection conv: (tile_h*Wo, Cmid_p) @ (Cmid_p, Cout_p) --
    y = jnp.dot(acc.reshape(tile_h * Wo, Cmid_p).astype(bf16), w3_ref[...],
                preferred_element_type=f32)
    y = (y + b3_ref[...]).reshape(1, tile_h, Wo, Cout_p)

    if use_res_connect:
        # stride == 1 and Cin == Cout -> Cin_p == Cout_p.  Re-read x from the
        # ref (short live range) and add the tile's interior rows.
        y = y + x_ref[:, pl.ds(row0 + 1, tile_h), :, :].astype(f32)

    out_ref[...] = y                                           # lane-dense (128k) store


def inverted_residual(x_pad, prepped, *, stride, tile_h=8):
    """Runs the block on a channel-padded, H-padded NHWC bf16 input.

    x_pad: (N, H+2, W, Cin_p) bf16, H zero-padded by 1 row on each side and
           channels zero-padded to Cin_p (multiple of 128).
    Returns (N, Ho, Wo, Cout_p) f32 in the same padded NHWC layout.
    """
    N, Hp, W, Cin_p = x_pad.shape
    H = Hp - 2
    assert stride in (1, 2)
    Cmid_p, Cout_p = prepped["Cmid_p"], prepped["Cout_p"]
    use_res_connect = (stride == 1) and (prepped["inp"] == prepped["oup"])

    Ho = (H - 1) // stride + 1
    Wo = (W - 1) // stride + 1

    # H-tile size: largest divisor of Ho that is <= the requested tile.  At real
    # MobileNetV2 shapes pick tile_h from the VMEM budget (scratch is
    # TH_in * W_pad * Cmid_p * 2 bytes); W should be a multiple of 8 to avoid
    # relayout copies around the reshape / interior store.
    tile_h = max(1, min(tile_h, Ho))
    while Ho % tile_h:
        tile_h -= 1
    n_h = Ho // tile_h
    TH_in = (tile_h - 1) * stride + 3        # input rows needed per tile (incl. halo)
    W_pad = LPAD + _round_up(W + 1, 8)       # aligned left pad + W + >=1 zero col right

    kernel = functools.partial(
        _inverted_residual_kernel,
        H=H, W=W, Wo=Wo, tile_h=tile_h, TH_in=TH_in, W_pad=W_pad,
        Cin_p=Cin_p, Cmid_p=Cmid_p, Cout_p=Cout_p,
        stride=stride, use_res_connect=use_res_connect,
    )

    w1, b1, dw, b2, w3, b3 = (prepped[k] for k in ("w1", "b1", "dw", "b2", "w3", "b3"))

    flops = (2 * N * n_h * TH_in * W * Cin_p * Cmid_p          # expand (incl. halo rows)
             + 18 * N * Ho * Wo * Cmid_p                       # depthwise MAC
             + 2 * N * Ho * Wo * Cmid_p * Cout_p)              # project
    bytes_accessed = (x_pad.size * 2 + w1.size * 2 + w3.size * 2
                      + (dw.size + b1.size + b2.size + b3.size) * 4
                      + N * Ho * Wo * Cout_p * 4)

    in_specs = [
        # Whole (H-padded) image for batch element n: block index is constant
        # across the h axis, so it is fetched once per image and stays resident.
        pl.BlockSpec((1, H + 2, W, Cin_p), lambda n, h: (n, 0, 0, 0)),
        # Weights / biases: full-array blocks with constant index maps
        # (fetched once, effectively whole-array VMEM residents).
        pl.BlockSpec((Cin_p, Cmid_p), lambda n, h: (0, 0)),
        pl.BlockSpec((1, Cmid_p), lambda n, h: (0, 0)),
        pl.BlockSpec((9, Cmid_p), lambda n, h: (0, 0)),
        pl.BlockSpec((1, Cmid_p), lambda n, h: (0, 0)),
        pl.BlockSpec((Cmid_p, Cout_p), lambda n, h: (0, 0)),
        pl.BlockSpec((1, Cout_p), lambda n, h: (0, 0)),
    ]
    out_spec = pl.BlockSpec((1, tile_h, Wo, Cout_p), lambda n, h: (n, h, 0, 0))

    return pl.pallas_call(
        kernel,
        out_shape=jax.ShapeDtypeStruct((N, Ho, Wo, Cout_p), jnp.float32),
        grid=(N, n_h),
        in_specs=in_specs,
        out_specs=out_spec,
        scratch_shapes=[pltpu.VMEM((TH_in, W_pad, Cmid_p), jnp.bfloat16)],
        compiler_params=pltpu.CompilerParams(
            dimension_semantics=("parallel", "arbitrary"),
            vmem_limit_bytes=48 * 1024 * 1024),
        cost_estimate=pl.CostEstimate(
            flops=flops, transcendentals=0, bytes_accessed=bytes_accessed),
    )(x_pad, w1, b1, dw, b2, w3, b3)


def prepare_params(params, inp, oup, expand_ratio):
    """Fold eval-mode BN into the conv weights, zero-pad channels to the 128-lane
    tile, cast matmul weights to bf16.  Done ONCE per network, not per call.
    The zero padding is load-bearing: it keeps all padded channels exactly zero
    through the whole block (including the residual path)."""
    Cmid = inp * expand_ratio
    Cin_p = _round_up(inp, LANE)
    Cmid_p = _round_up(Cmid, LANE)
    Cout_p = _round_up(oup, LANE)

    w1 = (params["w1"] * params["s1"]).astype(jnp.bfloat16)           # (Cin, Cmid)
    dw = (params["dw"] * params["s2"][0]).reshape(9, Cmid)            # (9, Cmid) f32
    w3 = (params["w3"] * params["s3"]).astype(jnp.bfloat16)           # (Cmid, Cout)

    return {
        "w1": jnp.pad(w1, ((0, Cin_p - inp), (0, Cmid_p - Cmid))),
        "dw": jnp.pad(dw, ((0, 0), (0, Cmid_p - Cmid))).astype(jnp.float32),
        "w3": jnp.pad(w3, ((0, Cmid_p - Cmid), (0, Cout_p - oup))),
        "b1": jnp.pad(params["b1"], ((0, 0), (0, Cmid_p - Cmid))),
        "b2": jnp.pad(params["b2"], ((0, 0), (0, Cmid_p - Cmid))),
        "b3": jnp.pad(params["b3"], ((0, 0), (0, Cout_p - oup))),
        "inp": inp, "oup": oup,
        "Cin_p": Cin_p, "Cmid_p": Cmid_p, "Cout_p": Cout_p,
    }


def prepare_input(x_nchw, Cin_p):
    """NCHW f32 -> H-padded, channel-padded NHWC bf16.  In a full network this
    padded-NHWC bf16 layout is the persistent inter-block layout (built once at
    the network entry rather than per block)."""
    N, Cin, H, W = x_nchw.shape
    x = jnp.transpose(x_nchw, (0, 2, 3, 1)).astype(jnp.bfloat16)
    return jnp.pad(x, ((0, 0), (1, 1), (0, 0), (0, Cin_p - Cin)))


def _fold_bn(gamma, beta, mean, var, eps=1e-5):
    scale = gamma / jnp.sqrt(var + eps)
    bias = beta - mean * scale
    return scale, bias


def make_params(key, inp, oup, expand_ratio):
    """Deterministic synthetic parameters (eval-mode BN stats)."""
    Cmid = inp * expand_ratio
    ks = jax.random.split(key, 6)

    def bn(k, c):
        kg, kb, km, kv = jax.random.split(k, 4)
        gamma = 1.0 + 0.1 * jax.random.normal(kg, (c,), jnp.float32)
        beta = 0.1 * jax.random.normal(kb, (c,), jnp.float32)
        mean = 0.1 * jax.random.normal(km, (c,), jnp.float32)
        var = jnp.abs(1.0 + 0.1 * jax.random.normal(kv, (c,), jnp.float32))
        return _fold_bn(gamma, beta, mean, var)

    w1 = 0.2 * jax.random.normal(ks[0], (inp, Cmid), jnp.float32)
    dw = 0.2 * jax.random.normal(ks[1], (3, 3, Cmid), jnp.float32)
    w3 = 0.2 * jax.random.normal(ks[2], (Cmid, oup), jnp.float32)
    s1, b1 = bn(ks[3], Cmid)
    s2, b2 = bn(ks[4], Cmid)
    s3, b3 = bn(ks[5], oup)

    return {
        "w1": w1, "s1": s1[None, :], "b1": b1[None, :],
        "dw": dw, "s2": s2[None, :], "b2": b2[None, :],
        "w3": w3, "s3": s3[None, :], "b3": b3[None, :],
    }


def reference(x_nchw, params, *, stride, expand_ratio):
    """Pure-JAX f32 reference matching the PyTorch module (eval-mode BN)."""
    N, Cin, H, W = x_nchw.shape
    Cmid = Cin * expand_ratio
    Cout = params["w3"].shape[1]
    x = jnp.transpose(x_nchw, (0, 2, 3, 1)).astype(jnp.float32)

    t = jnp.einsum("nhwc,cm->nhwm", x, params["w1"], precision=HIGHEST)
    t = jnp.clip(t * params["s1"][0] + params["b1"][0], 0.0, 6.0)

    rhs = params["dw"].reshape(3, 3, 1, Cmid)
    t = lax.conv_general_dilated(
        t, rhs, window_strides=(stride, stride), padding=((1, 1), (1, 1)),
        dimension_numbers=("NHWC", "HWIO", "NHWC"),
        feature_group_count=Cmid, precision=HIGHEST)
    t = jnp.clip(t * params["s2"][0] + params["b2"][0], 0.0, 6.0)

    y = jnp.einsum("nhwc,co->nhwo", t, params["w3"], precision=HIGHEST)
    y = y * params["s3"][0] + params["b3"][0]

    if stride == 1 and Cin == Cout:
        y = y + x
    return jnp.transpose(y, (0, 3, 1, 2))


if __name__ == "__main__":
    # Small config consistent with the module: stride=1, inp == oup -> residual.
    N, inp, oup, H, W = 2, 4, 4, 16, 16
    stride, expand_ratio = 1, 6

    key = jax.random.PRNGKey(0)
    kx, kp = jax.random.split(key)
    x_nchw = jax.random.normal(kx, (N, inp, H, W), jnp.float32)   # NCHW like PyTorch
    params = make_params(kp, inp, oup, expand_ratio)

    prepped = prepare_params(params, inp, oup, expand_ratio)      # once per network
    x_pad = prepare_input(x_nchw, prepped["Cin_p"])               # once per network input

    # tile_h=8 -> 2 H-tiles per image: exercises the halo / boundary logic.
    out_pad = inverted_residual(x_pad, prepped, stride=stride, tile_h=8)
    out_pad = jax.block_until_ready(out_pad)

    out = jnp.transpose(out_pad[:, :, :, :oup], (0, 3, 1, 2))     # padded NHWC -> NCHW

    ref = jax.block_until_ready(
        reference(x_nchw, params, stride=stride, expand_ratio=expand_ratio))
    # Tolerance reflects bf16 activations end-to-end (bf16 input, bf16 expanded-
    # activation scratch, bf16 MXU operands) vs. an all-f32 HIGHEST reference.
    np.testing.assert_allclose(np.asarray(out), np.asarray(ref),
                               atol=4e-2, rtol=4e-2)

    print("KERNEL_OK")
</pallas_src>

<mosaic_0001>
module attributes {stable_mosaic.version = 11 : i64} {
  func.func @_inverted_residual_kernel(%arg0: i32, %arg1: i32, %arg2: memref<1x18x16x128xbf16, #tpu.memory_space<vmem>>, %arg3: memref<128x128xbf16, #tpu.memory_space<vmem>>, %arg4: memref<1x128xf32, #tpu.memory_space<vmem>>, %arg5: memref<9x128xf32, #tpu.memory_space<vmem>>, %arg6: memref<1x128xf32, #tpu.memory_space<vmem>>, %arg7: memref<128x128xbf16, #tpu.memory_space<vmem>>, %arg8: memref<1x128xf32, #tpu.memory_space<vmem>>, %arg9: memref<1x8x16x128xf32, #tpu.memory_space<vmem>>, %arg10: memref<10x32x128xbf16, #tpu.memory_space<vmem>>) attributes {dimension_semantics = [#tpu.dimension_semantics<parallel>, #tpu.dimension_semantics<arbitrary>], iteration_bounds = array<i64: 2, 2>, scalar_prefetch = 0 : i64, scratch_operands = 1 : i64, tpu.core_type = #tpu.core_type<tc>, window_params = [{transform_indices = @transform_0, window_bounds = array<i64: 1, 18, 16, 128>}, {pipeline_mode = #tpu.pipeline_mode<synchronous>, transform_indices = @transform_1, window_bounds = array<i64: 128, 128>}, {pipeline_mode = #tpu.pipeline_mode<synchronous>, transform_indices = @transform_2, window_bounds = array<i64: 1, 128>}, {pipeline_mode = #tpu.pipeline_mode<synchronous>, transform_indices = @transform_3, window_bounds = array<i64: 9, 128>}, {pipeline_mode = #tpu.pipeline_mode<synchronous>, transform_indices = @transform_4, window_bounds = array<i64: 1, 128>}, {pipeline_mode = #tpu.pipeline_mode<synchronous>, transform_indices = @transform_5, window_bounds = array<i64: 128, 128>}, {pipeline_mode = #tpu.pipeline_mode<synchronous>, transform_indices = @transform_6, window_bounds = array<i64: 1, 128>}, {transform_indices = @transform_7, window_bounds = array<i64: 1, 8, 16, 128>}]} {
    %c8_i32 = arith.constant 8 : i32
    %0 = arith.muli %arg1, %c8_i32 : i32
    %1 = tpu.assume_multiple %0, 8 : i32
    %c0_i32 = arith.constant 0 : i32
    %2 = arith.cmpi eq, %arg1, %c0_i32 : i32
    %3 = arith.extui %2 : i1 to i32
    %c0_i32_0 = arith.constant 0 : i32
    %4 = arith.cmpi ne, %3, %c0_i32_0 : i32
    scf.if %4 {
      %cst_68 = arith.constant 0.000000e+00 : bf16
      %121 = vector.broadcast %cst_68 : bf16 to vector<10x8x128xbf16>
      %c0_69 = arith.constant 0 : index
      %c0_70 = arith.constant 0 : index
      %c0_71 = arith.constant 0 : index
      %122 = vector.load %arg10[%c0_69, %c0_70, %c0_71] : memref<10x32x128xbf16, #tpu.memory_space<vmem>>, vector<10x8x128xbf16>
      tpu.vector_store %arg10[%c0_69, %c0_70, %c0_71], %121 {strides = array<i32>} : memref<10x32x128xbf16, #tpu.memory_space<vmem>>, vector<10x8x128xbf16>,
      %cst_72 = arith.constant 0.000000e+00 : bf16
      %123 = vector.broadcast %cst_72 : bf16 to vector<10x8x128xbf16>
      %c0_73 = arith.constant 0 : index
      %c24 = arith.constant 24 : index
      %c0_74 = arith.constant 0 : index
      %124 = vector.load %arg10[%c0_73, %c24, %c0_74] : memref<10x32x128xbf16, #tpu.memory_space<vmem>>, vector<10x8x128xbf16>
      tpu.vector_store %arg10[%c0_73, %c24, %c0_74], %123 {strides = array<i32>} : memref<10x32x128xbf16, #tpu.memory_space<vmem>>, vector<10x8x128xbf16>,
    } else {
    }
    %c0 = arith.constant 0 : index
    %5 = arith.index_cast %1 : i32 to index
    %c0_1 = arith.constant 0 : index
    %c0_2 = arith.constant 0 : index
    %6 = vector.load %arg2[%c0, %5, %c0_1, %c0_2] : memref<1x18x16x128xbf16, #tpu.memory_space<vmem>>, vector<1x10x16x128xbf16>
    %7 = vector.shape_cast %6 : vector<1x10x16x128xbf16> to vector<160x128xbf16>
    %c0_3 = arith.constant 0 : index
    %c0_4 = arith.constant 0 : index
    %8 = vector.load %arg3[%c0_3, %c0_4] : memref<128x128xbf16, #tpu.memory_space<vmem>>, vector<128x128xbf16>
    %cst = arith.constant dense<0.000000e+00> : vector<160x128xf32>
    %9 = tpu.matmul %7, %8, %cst {dimension_numbers = #tpu.dot_dimension_numbers<[1], [0], [0], [1], [0, 0, 1, 1], [], []>} : vector<160x128xbf16>, vector<128x128xbf16>, vector<160x128xf32> -> vector<160x128xf32>
    %c0_5 = arith.constant 0 : index
    %c0_6 = arith.constant 0 : index
    %10 = vector.load %arg4[%c0_5, %c0_6] : memref<1x128xf32, #tpu.memory_space<vmem>>, vector<1x128xf32>
    %11 = vector.broadcast %10 : vector<1x128xf32> to vector<160x128xf32>
    %12 = arith.addf %9, %11 : vector<160x128xf32>
    %cst_7 = arith.constant 0.000000e+00 : f32
    %cst_8 = arith.constant 6.000000e+00 : f32
    %13 = vector.broadcast %cst_7 : f32 to vector<160x128xf32>
    %14 = arith.maximumf %13, %12 : vector<160x128xf32>
    %15 = vector.broadcast %cst_8 : f32 to vector<160x128xf32>
    %16 = arith.minimumf %15, %14 : vector<160x128xf32>
    %17 = arith.truncf %16 : vector<160x128xf32> to vector<160x128xbf16>
    %18 = vector.shape_cast %17 : vector<160x128xbf16> to vector<10x16x128xbf16>
    %c0_9 = arith.constant 0 : index
    %c8 = arith.constant 8 : index
    %c0_10 = arith.constant 0 : index
    %19 = vector.load %arg10[%c0_9, %c8, %c0_10] : memref<10x32x128xbf16, #tpu.memory_space<vmem>>, vector<10x16x128xbf16>
    tpu.vector_store %arg10[%c0_9, %c8, %c0_10], %18 {strides = array<i32>} : memref<10x32x128xbf16, #tpu.memory_space<vmem>>, vector<10x16x128xbf16>,
    %c0_i32_11 = arith.constant 0 : i32
    %20 = arith.cmpi eq, %1, %c0_i32_11 : i32
    %21 = arith.extui %20 : i1 to i32
    %c0_i32_12 = arith.constant 0 : i32
    %22 = arith.cmpi ne, %21, %c0_i32_12 : i32
    scf.if %22 {
      %cst_68 = arith.constant 0.000000e+00 : bf16
      %121 = vector.broadcast %cst_68 : bf16 to vector<1x32x128xbf16>
      %c0_69 = arith.constant 0 : index
      %c0_70 = arith.constant 0 : index
      %c0_71 = arith.constant 0 : index
      %122 = vector.load %arg10[%c0_69, %c0_70, %c0_71] : memref<10x32x128xbf16, #tpu.memory_space<vmem>>, vector<1x32x128xbf16>
      tpu.vector_store %arg10[%c0_69, %c0_70, %c0_71], %121 {strides = array<i32>} : memref<10x32x128xbf16, #tpu.memory_space<vmem>>, vector<1x32x128xbf16>,
    } else {
    }
    %c10_i32 = arith.constant 10 : i32
    %23 = arith.addi %1, %c10_i32 : i32
    %c1_i32 = arith.constant 1 : i32
    %24 = arith.subi %23, %c1_i32 : i32
    %c17_i32 = arith.constant 17 : i32
    %25 = arith.cmpi eq, %24, %c17_i32 : i32
    %26 = arith.extui %25 : i1 to i32
    %c0_i32_13 = arith.constant 0 : i32
    %27 = arith.cmpi ne, %26, %c0_i32_13 : i32
    scf.if %27 {
      %cst_68 = arith.constant 0.000000e+00 : bf16
      %121 = vector.broadcast %cst_68 : bf16 to vector<1x32x128xbf16>
      %c9_69 = arith.constant 9 : index
      %c0_70 = arith.constant 0 : index
      %c0_71 = arith.constant 0 : index
      %122 = vector.load %arg10[%c9_69, %c0_70, %c0_71] : memref<10x32x128xbf16, #tpu.memory_space<vmem>>, vector<1x32x128xbf16>
      tpu.vector_store %arg10[%c9_69, %c0_70, %c0_71], %121 {strides = array<i32>} : memref<10x32x128xbf16, #tpu.memory_space<vmem>>, vector<1x32x128xbf16>,
    } else {
    }
    %c0_14 = arith.constant 0 : index
    %c7 = arith.constant 7 : index
    %c0_15 = arith.constant 0 : index
    %28 = vector.load %arg10[%c0_14, %c7, %c0_15] : memref<10x32x128xbf16, #tpu.memory_space<vmem>>, vector<8x16x128xbf16>
    %29 = arith.extf %28 : vector<8x16x128xbf16> to vector<8x16x128xf32>
    %c0_16 = arith.constant 0 : index
    %c0_17 = arith.constant 0 : index
    %30 = vector.load %arg5[%c0_16, %c0_17] : memref<9x128xf32, #tpu.memory_space<vmem>>, vector<1x128xf32>
    %31 = vector.shape_cast %30 : vector<1x128xf32> to vector<128xf32>
    %32 = vector.shape_cast %31 : vector<128xf32> to vector<1x1x128xf32>
    %33 = vector.broadcast %32 : vector<1x1x128xf32> to vector<8x16x128xf32>
    %34 = arith.mulf %29, %33 : vector<8x16x128xf32>
    %c0_18 = arith.constant 0 : index
    %c8_19 = arith.constant 8 : index
    %c0_20 = arith.constant 0 : index
    %35 = vector.load %arg10[%c0_18, %c8_19, %c0_20] : memref<10x32x128xbf16, #tpu.memory_space<vmem>>, vector<8x16x128xbf16>
    %36 = arith.extf %35 : vector<8x16x128xbf16> to vector<8x16x128xf32>
    %c1 = arith.constant 1 : index
    %c0_21 = arith.constant 0 : index
    %37 = vector.load %arg5[%c1, %c0_21] : memref<9x128xf32, #tpu.memory_space<vmem>>, vector<1x128xf32>
    %38 = vector.shape_cast %37 : vector<1x128xf32> to vector<128xf32>
    %39 = vector.shape_cast %38 : vector<128xf32> to vector<1x1x128xf32>
    %40 = vector.broadcast %39 : vector<1x1x128xf32> to vector<8x16x128xf32>
    %41 = arith.mulf %36, %40 : vector<8x16x128xf32>
    %42 = arith.addf %34, %41 : vector<8x16x128xf32>
    %c0_22 = arith.constant 0 : index
    %c9 = arith.constant 9 : index
    %c0_23 = arith.constant 0 : index
    %43 = vector.load %arg10[%c0_22, %c9, %c0_23] : memref<10x32x128xbf16, #tpu.memory_space<vmem>>, vector<8x16x128xbf16>
    %44 = arith.extf %43 : vector<8x16x128xbf16> to vector<8x16x128xf32>
    %c2 = arith.constant 2 : index
    %c0_24 = arith.constant 0 : index
    %45 = vector.load %arg5[%c2, %c0_24] : memref<9x128xf32, #tpu.memory_space<vmem>>, vector<1x128xf32>
    %46 = vector.shape_cast %45 : vector<1x128xf32> to vector<128xf32>
    %47 = vector.shape_cast %46 : vector<128xf32> to vector<1x1x128xf32>
    %48 = vector.broadcast %47 : vector<1x1x128xf32> to vector<8x16x128xf32>
    %49 = arith.mulf %44, %48 : vector<8x16x128xf32>
    %50 = arith.addf %42, %49 : vector<8x16x128xf32>
    %c1_25 = arith.constant 1 : index
    %c7_26 = arith.constant 7 : index
    %c0_27 = arith.constant 0 : index
    %51 = vector.load %arg10[%c1_25, %c7_26, %c0_27] : memref<10x32x128xbf16, #tpu.memory_space<vmem>>, vector<8x16x128xbf16>
    %52 = arith.extf %51 : vector<8x16x128xbf16> to vector<8x16x128xf32>
    %c3 = arith.constant 3 : index
    %c0_28 = arith.constant 0 : index
    %53 = vector.load %arg5[%c3, %c0_28] : memref<9x128xf32, #tpu.memory_space<vmem>>, vector<1x128xf32>
    %54 = vector.shape_cast %53 : vector<1x128xf32> to vector<128xf32>
    %55 = vector.shape_cast %54 : vector<128xf32> to vector<1x1x128xf32>
    %56 = vector.broadcast %55 : vector<1x1x128xf32> to vector<8x16x128xf32>
    %57 = arith.mulf %52, %56 : vector<8x16x128xf32>
    %58 = arith.addf %50, %57 : vector<8x16x128xf32>
    %c1_29 = arith.constant 1 : index
    %c8_30 = arith.constant 8 : index
    %c0_31 = arith.constant 0 : index
    %59 = vector.load %arg10[%c1_29, %c8_30, %c0_31] : memref<10x32x128xbf16, #tpu.memory_space<vmem>>, vector<8x16x128xbf16>
    %60 = arith.extf %59 : vector<8x16x128xbf16> to vector<8x16x128xf32>
    %c4 = arith.constant 4 : index
    %c0_32 = arith.constant 0 : index
    %61 = vector.load %arg5[%c4, %c0_32] : memref<9x128xf32, #tpu.memory_space<vmem>>, vector<1x128xf32>
    %62 = vector.shape_cast %61 : vector<1x128xf32> to vector<128xf32>
    %63 = vector.shape_cast %62 : vector<128xf32> to vector<1x1x128xf32>
    %64 = vector.broadcast %63 : vector<1x1x128xf32> to vector<8x16x128xf32>
    %65 = arith.mulf %60, %64 : vector<8x16x128xf32>
    %66 = arith.addf %58, %65 : vector<8x16x128xf32>
    %c1_33 = arith.constant 1 : index
    %c9_34 = arith.constant 9 : index
    %c0_35 = arith.constant 0 : index
    %67 = vector.load %arg10[%c1_33, %c9_34, %c0_35] : memref<10x32x128xbf16, #tpu.memory_space<vmem>>, vector<8x16x128xbf16>
    %68 = arith.extf %67 : vector<8x16x128xbf16> to vector<8x16x128xf32>
    %c5 = arith.constant 5 : index
    %c0_36 = arith.constant 0 : index
    %69 = vector.load %arg5[%c5, %c0_36] : memref<9x128xf32, #tpu.memory_space<vmem>>, vector<1x128xf32>
    %70 = vector.shape_cast %69 : vector<1x128xf32> to vector<128xf32>
    %71 = vector.shape_cast %70 : vector<128xf32> to vector<1x1x128xf32>
    %72 = vector.broadcast %71 : vector<1x1x128xf32> to vector<8x16x128xf32>
    %73 = arith.mulf %68, %72 : vector<8x16x128xf32>
    %74 = arith.addf %66, %73 : vector<8x16x128xf32>
    %c2_37 = arith.constant 2 : index
    %c7_38 = arith.constant 7 : index
    %c0_39 = arith.constant 0 : index
    %75 = vector.load %arg10[%c2_37, %c7_38, %c0_39] : memref<10x32x128xbf16, #tpu.memory_space<vmem>>, vector<8x16x128xbf16>
    %76 = arith.extf %75 : vector<8x16x128xbf16> to vector<8x16x128xf32>
    %c6 = arith.constant 6 : index
    %c0_40 = arith.constant 0 : index
    %77 = vector.load %arg5[%c6, %c0_40] : memref<9x128xf32, #tpu.memory_space<vmem>>, vector<1x128xf32>
    %78 = vector.shape_cast %77 : vector<1x128xf32> to vector<128xf32>
    %79 = vector.shape_cast %78 : vector<128xf32> to vector<1x1x128xf32>
    %80 = vector.broadcast %79 : vector<1x1x128xf32> to vector<8x16x128xf32>
    %81 = arith.mulf %76, %80 : vector<8x16x128xf32>
    %82 = arith.addf %74, %81 : vector<8x16x128xf32>
    %c2_41 = arith.constant 2 : index
    %c8_42 = arith.constant 8 : index
    %c0_43 = arith.constant 0 : index
    %83 = vector.load %arg10[%c2_41, %c8_42, %c0_43] : memref<10x32x128xbf16, #tpu.memory_space<vmem>>, vector<8x16x128xbf16>
    %84 = arith.extf %83 : vector<8x16x128xbf16> to vector<8x16x128xf32>
    %c7_44 = arith.constant 7 : index
    %c0_45 = arith.constant 0 : index
    %85 = vector.load %arg5[%c7_44, %c0_45] : memref<9x128xf32, #tpu.memory_space<vmem>>, vector<1x128xf32>
    %86 = vector.shape_cast %85 : vector<1x128xf32> to vector<128xf32>
    %87 = vector.shape_cast %86 : vector<128xf32> to vector<1x1x128xf32>
    %88 = vector.broadcast %87 : vector<1x1x128xf32> to vector<8x16x128xf32>
    %89 = arith.mulf %84, %88 : vector<8x16x128xf32>
    %90 = arith.addf %82, %89 : vector<8x16x128xf32>
    %c2_46 = arith.constant 2 : index
    %c9_47 = arith.constant 9 : index
    %c0_48 = arith.constant 0 : index
    %91 = vector.load %arg10[%c2_46, %c9_47, %c0_48] : memref<10x32x128xbf16, #tpu.memory_space<vmem>>, vector<8x16x128xbf16>
    %92 = arith.extf %91 : vector<8x16x128xbf16> to vector<8x16x128xf32>
    %c8_49 = arith.constant 8 : index
    %c0_50 = arith.constant 0 : index
    %93 = vector.load %arg5[%c8_49, %c0_50] : memref<9x128xf32, #tpu.memory_space<vmem>>, vector<1x128xf32>
    %94 = vector.shape_cast %93 : vector<1x128xf32> to vector<128xf32>
    %95 = vector.shape_cast %94 : vector<128xf32> to vector<1x1x128xf32>
    %96 = vector.broadcast %95 : vector<1x1x128xf32> to vector<8x16x128xf32>
    %97 = arith.mulf %92, %96 : vector<8x16x128xf32>
    %98 = arith.addf %90, %97 : vector<8x16x128xf32>
    %c0_51 = arith.constant 0 : index
    %c0_52 = arith.constant 0 : index
    %99 = vector.load %arg6[%c0_51, %c0_52] : memref<1x128xf32, #tpu.memory_space<vmem>>, vector<1x128xf32>
    %100 = vector.shape_cast %99 : vector<1x128xf32> to vector<1x1x128xf32>
    %101 = vector.broadcast %100 : vector<1x1x128xf32> to vector<8x16x128xf32>
    %102 = arith.addf %98, %101 : vector<8x16x128xf32>
    %cst_53 = arith.constant 0.000000e+00 : f32
    %cst_54 = arith.constant 6.000000e+00 : f32
    %103 = vector.broadcast %cst_53 : f32 to vector<8x16x128xf32>
    %104 = arith.maximumf %103, %102 : vector<8x16x128xf32>
    %105 = vector.broadcast %cst_54 : f32 to vector<8x16x128xf32>
    %106 = arith.minimumf %105, %104 : vector<8x16x128xf32>
    %107 = vector.shape_cast %106 : vector<8x16x128xf32> to vector<128x128xf32>
    %108 = arith.truncf %107 : vector<128x128xf32> to vector<128x128xbf16>
    %c0_55 = arith.constant 0 : index
    %c0_56 = arith.constant 0 : index
    %109 = vector.load %arg7[%c0_55, %c0_56] : memref<128x128xbf16, #tpu.memory_space<vmem>>, vector<128x128xbf16>
    %cst_57 = arith.constant dense<0.000000e+00> : vector<128x128xf32>
    %110 = tpu.matmul %108, %109, %cst_57 {dimension_numbers = #tpu.dot_dimension_numbers<[1], [0], [0], [1], [0, 0, 1, 1], [], []>} : vector<128x128xbf16>, vector<128x128xbf16>, vector<128x128xf32> -> vector<128x128xf32>
    %c0_58 = arith.constant 0 : index
    %c0_59 = arith.constant 0 : index
    %111 = vector.load %arg8[%c0_58, %c0_59] : memref<1x128xf32, #tpu.memory_space<vmem>>, vector<1x128xf32>
    %112 = vector.broadcast %111 : vector<1x128xf32> to vector<128x128xf32>
    %113 = arith.addf %110, %112 : vector<128x128xf32>
    %114 = vector.shape_cast %113 : vector<128x128xf32> to vector<1x8x16x128xf32>
    %c1_i32_60 = arith.constant 1 : i32
    %115 = arith.addi %1, %c1_i32_60 : i32
    %c0_61 = arith.constant 0 : index
    %116 = arith.index_cast %115 : i32 to index
    %c0_62 = arith.constant 0 : index
    %c0_63 = arith.constant 0 : index
    %117 = vector.load %arg2[%c0_61, %116, %c0_62, %c0_63] : memref<1x18x16x128xbf16, #tpu.memory_space<vmem>>, vector<1x8x16x128xbf16>
    %118 = arith.extf %117 : vector<1x8x16x128xbf16> to vector<1x8x16x128xf32>
    %119 = arith.addf %114, %118 : vector<1x8x16x128xf32>
    %c0_64 = arith.constant 0 : index
    %c0_65 = arith.constant 0 : index
    %c0_66 = arith.constant 0 : index
    %c0_67 = arith.constant 0 : index
    %120 = vector.load %arg9[%c0_64, %c0_65, %c0_66, %c0_67] : memref<1x8x16x128xf32, #tpu.memory_space<vmem>>, vector<1x8x16x128xf32>
    tpu.vector_store %arg9[%c0_64, %c0_65, %c0_66, %c0_67], %119 {strides = array<i32>} : memref<1x8x16x128xf32, #tpu.memory_space<vmem>>, vector<1x8x16x128xf32>,
    return
  }
  func.func @transform_0(%arg0: i32, %arg1: i32) -> (i32, i32, i32, i32) {
    %c0_i32 = arith.constant 0 : i32
    %c0_i32_0 = arith.constant 0 : i32
    %c0_i32_1 = arith.constant 0 : i32
    %c0_i32_2 = arith.constant 0 : i32
    return %arg0, %c0_i32, %c0_i32_0, %c0_i32_1 : i32, i32, i32, i32
  }
  func.func @transform_1(%arg0: i32, %arg1: i32) -> (i32, i32) {
    %c0_i32 = arith.constant 0 : i32
    %c0_i32_0 = arith.constant 0 : i32
    %c0_i32_1 = arith.constant 0 : i32
    return %c0_i32, %c0_i32_0 : i32, i32
  }
  func.func @transform_2(%arg0: i32, %arg1: i32) -> (i32, i32) {
    %c0_i32 = arith.constant 0 : i32
    %c0_i32_0 = arith.constant 0 : i32
    %c0_i32_1 = arith.constant 0 : i32
    return %c0_i32, %c0_i32_0 : i32, i32
  }
  func.func @transform_3(%arg0: i32, %arg1: i32) -> (i32, i32) {
    %c0_i32 = arith.constant 0 : i32
    %c0_i32_0 = arith.constant 0 : i32
    %c0_i32_1 = arith.constant 0 : i32
    return %c0_i32, %c0_i32_0 : i32, i32
  }
  func.func @transform_4(%arg0: i32, %arg1: i32) -> (i32, i32) {
    %c0_i32 = arith.constant 0 : i32
    %c0_i32_0 = arith.constant 0 : i32
    %c0_i32_1 = arith.constant 0 : i32
    return %c0_i32, %c0_i32_0 : i32, i32
  }
  func.func @transform_5(%arg0: i32, %arg1: i32) -> (i32, i32) {
    %c0_i32 = arith.constant 0 : i32
    %c0_i32_0 = arith.constant 0 : i32
    %c0_i32_1 = arith.constant 0 : i32
    return %c0_i32, %c0_i32_0 : i32, i32
  }
  func.func @transform_6(%arg0: i32, %arg1: i32) -> (i32, i32) {
    %c0_i32 = arith.constant 0 : i32
    %c0_i32_0 = arith.constant 0 : i32
    %c0_i32_1 = arith.constant 0 : i32
    return %c0_i32, %c0_i32_0 : i32, i32
  }
  func.func @transform_7(%arg0: i32, %arg1: i32) -> (i32, i32, i32, i32) {
    %c0_i32 = arith.constant 0 : i32
    %c0_i32_0 = arith.constant 0 : i32
    %c0_i32_1 = arith.constant 0 : i32
    return %arg0, %arg1, %c0_i32, %c0_i32_0 : i32, i32, i32, i32
  }
}

</mosaic_0001>

<bundles_post_ra>
// kernel: tpu_custom_call.1
= control target key start
LH: loop header
LB: loop body
LE: loop exit
PB: predicated region body
PF: predicated region fallthrough
CT: control target
= control target key end

     0   :  { %s3879_s0 = inlined_call_operand.hbm [shape: bf16[2,18,16,128], index: 0, kind: input, shape index: {}]   ;;  %s3880_s1 = inlined_call_operand.hbm [shape: bf16[128,128], index: 1, kind: input, shape index: {}]   ;;  %s3881_s2 = inlined_call_operand.vmem [shape: f32[1,128], index: 2, kind: input, shape index: {}]   ;;  %s3882_s3 = inlined_call_operand.hbm [shape: f32[9,128], index: 3, kind: input, shape index: {}]   ;;  %s3883_s4 = inlined_call_operand.vmem [shape: f32[1,128], index: 4, kind: input, shape index: {}]   ;;  %s3884_s5 = inlined_call_operand.hbm [shape: bf16[128,128], index: 5, kind: input, shape index: {}]   ;;  %s3885_s6 = inlined_call_operand.vmem [shape: f32[1,128], index: 6, kind: input, shape index: {}]   ;;  %s3886_s7 = inlined_call_operand.hbm [shape: f32[2,16,16,128], index: 7, kind: output, shape index: {}]  }
   0x1   :  { %3898 = sst [smem:[#allocation23_spill]] %s3880_s1 }
   0x2   :  { %3899 = sst [smem:[#allocation24_spill]] %s3882_s3 }
   0x3   :  { %3900 = sst [smem:[#allocation25_spill]] %s3884_s5 }
   0x4   :  { %3901 = sst [smem:[#allocation26_spill]] %s3886_s7 }
   0x5   :  { %12 = vsyncpa [#allocation4], 0 }
   0x6   :  { %14 = vsyncpa [#allocation4 + $0x1], 0 }
   0x7   :  { %15 = vsyncpa [#allocation7], 0 }
   0x8   :  { %16 = vsyncpa [#allocation10], 0 }
   0x9   :  { %17 = vsyncpa [#allocation5], 0 }
   0xa   :  { %19 = vsyncpa [#allocation5 + $0x1], 0  ;;  %s3170_s24 = smov 0   ;;  %s3172_s25 = smov 0  }
   0xb   :  { %s3174_s26 = smov 0   ;;  %s3176_s27 = smov 0  }
   0xc   :  { %s3178_s28 = smov 0   ;;  %s3180_s29 = smov 0  }
   0xd   :  { %s3182_s30 = smov 0   ;;  %s3184_s8 = smov 0  }
   0xe   :  { %s3186_s9 = smov 0   ;;  %s3188_s10 = smov 0  }
   0xf   :  { %s3190_s11 = smov 0  }
  0x10 LB: > { %3902 = sst [smem:[#allocation16_spill]] %s3074_s24  ;;  %s2431_s12 = sadd.s32 4294967295, %s3114_s11   ;;  %s3114_s11 = sphi %s3190_s11, %s25_s11   ;;  %s3110_s10 = sphi %s3188_s10, %s3941_s10   ;;  %s3106_s9 = sphi %s3186_s9, %s3932_s9   ;;  %s3102_s8 = sphi %s3184_s8, %s3940_s8   ;;  %s3098_s30 = sphi %s3182_s30, %s3931_s30   ;;  %s3094_s29 = sphi %s3180_s29, %s3939_s29   ;;  %s3090_s28 = sphi %s3178_s28, %s3938_s28   ;;  %s3086_s27 = sphi %s3176_s27, %s3937_s27   ;;  %s3082_s26 = sphi %s3174_s26, %s3936_s26   ;;  %s3078_s25 = sphi %s3172_s25, %s3935_s25   ;;  %s3074_s24 = sphi %s3170_s24, %s3934_s24  }
  0x11   : > { %3903 = sst [smem:[#allocation17_spill]] %s3102_s8  ;;  %s2432_s13 = sadd.s32 4294967294, %s3114_s11  }
  0x12   : > { %3904 = sst [smem:[#allocation18_spill]] %s3106_s9  ;;  %p57_p0 = scmp.ne.s32.totalorder %s3090_s28, %s3086_s27 }
  0x13   : > { %p3226_p1 = scmp.eq.s32.totalorder %s2431_s12, 0  ;;  %p208_p2 = scmp.ne.s32.totalorder %s3082_s26, %s3078_s25 }
  0x14   : > { %p209_p4 = scmp.eq.s32.totalorder %s2431_s12, 3  ;;  %p214_p5 = scmp.ne.s32.totalorder %s3078_s25, %s3074_s24 }
  0x15   : > { %p3235_p3 = por %p3226_p1, %p57_p0  ;;  %p215_p6 = scmp.eq.s32.totalorder %s2432_s13, 3 }
  0x16   : > { %p3241_p7 = por %p209_p4, %p208_p2  ;;  %p2433_p8 = scmp.ge.s32.totalorder %s3114_s11, 1 }
  0x17   : > { %p3246_p9 = por %p215_p6, %p214_p5  ;;  %p222_p10 = scmp.lt.s32.totalorder %s3114_s11, 5 }
  0x18   : > { %s3907_s17 = scalar_select %p3241_p7, 1, 0 }
  0x19   : > { %s3909_s18 = scalar_select %p3246_p9, 1, 0 }
  0x1a   : > { %3908 = sst [smem:[#allocation19_spill]] %s3907_s17  ;;  %p3251_p11 = pnand %p2433_p8, %p222_p10 }
  0x1b   : > { %3910 = sst [smem:[#allocation20_spill]] %s3909_s18  ;;  %s3116_s20 = smov [#allocation6]  }
  0x1c   : > { %s234_s21 = sshll.u32 %s3116_s20, 4  ;;  %p2718_p12 = pneg %p3251_p11  ;;  %s235_s21 = int_to_ptr.vmem [resolvable:$true] %s234_s21 }
  0x1d   : > { %s3117_s23 = smov [#allocation8]   ;;  %s2891_s12 = scalar_lea.vmem %s235_s21, 1024 }
  0x1e   : > { %p3259_p13 = pnand %p2718_p12, %p3226_p1  ;;  %s250_s27 = sshll.u32 %s3117_s23, 4  ;;  %s251_s27 = int_to_ptr.vmem [resolvable:$true] %s250_s27 }
  0x1f   : > { %p2892_p2 = scmp.ne.s32.totalorder %s235_s21, %s2891_s12  ;;  %p2899_p6 = scmp.lt.s32.totalorder %s235_s21, %s235_s21 }
  0x20   : > { %p2882_p0 = pneg %p3259_p13  ;;  %p2900_p8 = scmp.lt.s32.totalorder %s2891_s12, %s2891_s12 }
  0x22   : > { %p2894_p4 = pnand %p2892_p2, %p2882_p0  ;;  %p2901_p10 = por %p2900_p8, %p2899_p6 }
  0x24   : > { %p2895_p5 = pneg %p2894_p4 }
  0x26   : > { %p2902_p12 = pnand %p2901_p10, %p2895_p5 }
  0x28   : > { %2905 = shalt.err (!%p2902_p12)
}
  0x29   : > { %s3892_s13 = smov 64   ;;  %s3893_s20 = smov 4  }
  0x2a   : > { %s3913_s1 = sld [smem:[#allocation23_spill]]  ;;  %s2917_s18 = scalar_lea.vmem %s251_s27, 256 }
  0x2b   : > { %p2918_p2 = scmp.ne.s32.totalorder %s251_s27, %s2917_s18  ;;  %p2925_p5 = scmp.lt.s32.totalorder %s251_s27, %s251_s27 }
  0x2c   : > { %p2926_p8 = scmp.lt.s32.totalorder %s2917_s18, %s2917_s18 }
  0x2d   : > { %p2920_p4 = pnand %p2918_p2, %p2882_p0 }
  0x2e   : > { %p2927_p10 = por %p2926_p8, %p2925_p5 }
  0x2f   : > { %p2921_p6 = pneg %p2920_p4 }
  0x30   : > { %2721 = dma.hbm_to_vmem [thread:$0]  (!%p3259_p13), %s3913_s1, 1024, %s235_s21, [#allocation7], %s3892_s13, %s3892_s13, %s3893_s20  }
  0x31   : > { %p2928_p12 = pnand %p2927_p10, %p2921_p6 }
  0x33   : > { %2931 = shalt.err (!%p2928_p12)
}
  0x34   : > { %s3120_s12 = smov 128   ;;  %s3121_s24 = smov 8  }
  0x35   : > { %s3914_s3 = sld [smem:[#allocation24_spill]]  ;;  %s3122_s15 = smov [#allocation9]  }
  0x36   : > { %s266_s21 = sshll.u32 %s3122_s15, 4  ;;  %s267_s21 = int_to_ptr.vmem [resolvable:$true] %s266_s21 }
  0x37   : > { %s2943_s23 = scalar_lea.vmem %s267_s21, 1024  ;;  %p2951_p6 = scmp.lt.s32.totalorder %s267_s21, %s267_s21 }
  0x38   : > { %p2944_p2 = scmp.ne.s32.totalorder %s267_s21, %s2943_s23  ;;  %p2952_p8 = scmp.lt.s32.totalorder %s2943_s23, %s2943_s23 }
  0x3a   : > { %p2946_p4 = pnand %p2944_p2, %p2882_p0  ;;  %p2953_p10 = por %p2952_p8, %p2951_p6 }
  0x3b   : > { %2724 = dma.hbm_to_vmem [thread:$0]  (!%p3259_p13), %s3914_s3, 256, %s251_s27, [#allocation7], %s3120_s12, %s3120_s12, %s3121_s24  }
  0x3c   : > { %p2947_p5 = pneg %p2946_p4 }
  0x3e   : > { %p2954_p12 = pnand %p2953_p10, %p2947_p5 }
  0x40   : > { %2957 = shalt.err (!%p2954_p12)
}
  0x41   : > { %s3915_s5 = sld [smem:[#allocation25_spill]]  ;;  %s34_s17 = sadd.s32 1, %s3106_s9 }
  0x42   : > { %p35_p0 = scmp.ge.s32.totalorder %s34_s17, 2  ;;  %s37_s18 = sadd.s32 1, %s3110_s10 }
  0x43   : > { %s44_s22 = sadd.s32 1, %s3094_s29  ;;  %p51_p2 = scmp.ne.s32.totalorder %s3094_s29, %s3090_s28 }
  0x44   : > { %s3943_s17 = smov (%p35_p0, %s34_s17), 0  ;;  %s3945_s18 = smov (!%p35_p0, %s37_s18), %s3110_s10 }
  0x45   : > { %3916 = sst [smem:[#allocation21_spill]] %s3943_s17  ;;  %p52_p4 = scmp.eq.s32.totalorder %s3114_s11, 0 }
  0x46   : > { %s194_s27 = ssub.s32 %s3106_s9, %s3943_s17  ;;  %p39_p5 = scmp.ge.s32.totalorder %s3945_s18, 2 }
  0x47   : > { %2727 = dma.hbm_to_vmem [thread:$0]  (!%p3259_p13), %s3915_s5, 1024, %s267_s21, [#allocation10], %s3892_s13, %s3892_s13, %s3893_s20  }
  0x48   : > { %p2739_p6 = scmp.lt.s32.totalorder %s3114_s11, 4  ;;  %p3307_p13 = por %p52_p4, %p51_p2 }
  0x49   : > { %s283_s15 = sand.u32 1, %s3094_s29   ;;  %s3947_s18 = smov (%p39_p5, %s3945_s18), 0 }
  0x4a   : > { %3918 = sst [smem:[#allocation22_spill]] %s3947_s18  ;;  %s2699_s21 = smul.u32 144, %s283_s15 }
  0x4b   : > { %s41_s23 = ssub.s32 %s3110_s10, %s3947_s18  ;;  %s2700_s7 = smul.u32 2304, %s3110_s10 }
  0x4c   : > { %p42_p8 = scmp.eq.s32.totalorder %s41_s23, 0  ;;  %s195_s24 = sor.u32 %s194_s27, %s41_s23 }
  0x4d   : > { %p196_p10 = scmp.eq.s32.totalorder %s195_s24, 0  ;;  %s3919_s20 = sadd.s32 1, %s3082_s26 }
  0x4e   : > { %s3318_s13 = scalar_select %p42_p8, %s3094_s29, %s44_s22  }
  0x4f   : > { %s3323_s1 = scalar_select %p196_p10, %s3082_s26, %s3919_s20  }
  0x50   : > { %s293_s17 = scalar_lea.hbm %s3879_s0, %s2700_s7  ;;  %s287_s9 = scalar_lea.vmem [#allocation3], %s2699_s21 }
  0x51   : > { %s294_s8 = sshll.u32 %s287_s9, 4  ;;  %p3332_p12 = pnand %p2739_p6, %p3307_p13  ;;  %s295_s8 = int_to_ptr.vmem [resolvable:$true] %s294_s8 }
  0x52   : > { %s284_s27 = scalar_lea.sflag [#allocation4], %s283_s15  ;;  %s2971_s22 = scalar_lea.vmem %s295_s8, 2304 }
  0x53   : > { %p2960_p0 = pneg %p3332_p12  ;;  %p2972_p2 = scmp.ne.s32.totalorder %s295_s8, %s2971_s22 }
  0x54   : > { %s3123_s20 = smov [#allocation3]  }
  0x55   : > { %p2974_p4 = pnand %p2972_p2, %p2960_p0  ;;  %s2976_s3 = sshll.u32 %s3123_s20, 4  ;;  %s2977_s3 = int_to_ptr.vmem [resolvable:$false] %s2976_s3 }
  0x56   : > { %s2978_s5 = scalar_lea.vmem %s2977_s3, 4608  ;;  %p2979_p8 = scmp.lt.s32.totalorder %s295_s8, %s2977_s3 }
  0x57   : > { %p2975_p5 = pneg %p2974_p4  ;;  %p2980_p10 = scmp.lt.s32.totalorder %s2978_s5, %s2971_s22 }
  0x59   : > { %p2981_p9 = por %p2980_p10, %p2979_p8 }
  0x5b   : > { %p2982_p7 = pnand %p2981_p9, %p2975_p5 }
  0x5d   : > { %2985 = shalt.err (!%p2982_p7)
}
  0x5e   : > { %s3921_s9 = smov 4   ;;  %s3922_s12 = smov 64  }
  0x5f   : > { %2731 = dma.hbm_to_vmem [thread:$0]  (!%p3332_p12), %s293_s17, 2304, %s295_s8, %s284_s27, %s3922_s12, %s3922_s12, %s3921_s9  }
  0x60   : > { %306 = sbr.rel (%p3251_p11) target bundleno = 841 (0x349), region = 48  ;;  %s308_s15 = sand.u32 (!%p3251_p11), 1, %s3090_s28  }
  0x61   : > { %s3346_s21 = smul.u32 (!%p3251_p11), 144, %s308_s15  ;;  %s309_s23 = scalar_lea.sflag (!%p3251_p11), [#allocation4], %s308_s15 }
  0x63   : > { %s312_s7 = scalar_lea.vmem (!%p3251_p11), [#allocation3], %s3346_s21 }
  0x65   : > { %3057 = dma.done.wait (%p3235_p3), %s309_s23, 2304  }
  0x66   : > { %3059 = vsyncadd (%p3235_p3), %s309_s23, 4294964992 }
  0x67   : > { %3061 = dma.done.wait (%p3226_p1), [#allocation7], 1280  }
  0x68   : > { %3063 = vsyncadd (%p3226_p1), [#allocation7], 4294966016 }
  0x69   : > { %3065 = dma.done.wait (%p3226_p1), [#allocation10], 1024  }
  0x6a   : > { %3067 = vsyncadd (%p3226_p1), [#allocation10], 4294966272  ;;  %s352_s8 = sand.u32 1, %s3078_s25   ;;  %s2444_s19 = sshll.u32 %s3098_s30, 3 }
  0x6b   : > { %s2443_s16 = sshll.u32 %s352_s8, 7  ;;  %p2445_p3 = scmp.ne.s32.totalorder %s3098_s30, 0 }
  0x6c   : > { %s3365_s17 = scalar_lea.vmem [#allocation11], %s2443_s16 }
  0x6d   : > { %361 = sbr.rel (%p2445_p3) target bundleno = 125 (0x7d), region = 68 }
  0x72   : > { %v3124_v0 = vmov 0  }
  0x73   : > { %362 = vst [vmem:[#allocation2] sm:$0xf] %v3124_v0  ;;  %363 = vst [vmem:[#allocation2 + $0x10] sm:$0xf] %v3124_v0 }
  0x74   : > { %364 = vst [vmem:[#allocation2 + $0x20] sm:$0xf] %v3124_v0  ;;  %365 = vst [vmem:[#allocation2 + $0x30] sm:$0xf] %v3124_v0 }
  0x75   : > { %366 = vst [vmem:[#allocation2 + $0x40] sm:$0xf] %v3124_v0  ;;  %367 = vst [vmem:[#allocation2 + $0x50] sm:$0xf] %v3124_v0 }
  0x76   : > { %368 = vst [vmem:[#allocation2 + $0x60] sm:$0xf] %v3124_v0  ;;  %369 = vst [vmem:[#allocation2 + $0x70] sm:$0xf] %v3124_v0 }
  0x77   : > { %370 = vst [vmem:[#allocation2 + $0x80] sm:$0xf] %v3124_v0  ;;  %371 = vst [vmem:[#allocation2 + $0x90] sm:$0xf] %v3124_v0 }
  0x78   : > { %372 = vst [vmem:[#allocation2 + $0xc] sm:$0xf] %v3124_v0  ;;  %373 = vst [vmem:[#allocation2 + $0x1c] sm:$0xf] %v3124_v0 }
  0x79   : > { %374 = vst [vmem:[#allocation2 + $0x2c] sm:$0xf] %v3124_v0  ;;  %375 = vst [vmem:[#allocation2 + $0x3c] sm:$0xf] %v3124_v0 }
  0x7a   : > { %376 = vst [vmem:[#allocation2 + $0x4c] sm:$0xf] %v3124_v0  ;;  %377 = vst [vmem:[#allocation2 + $0x5c] sm:$0xf] %v3124_v0 }
  0x7b   : > { %378 = vst [vmem:[#allocation2 + $0x6c] sm:$0xf] %v3124_v0  ;;  %379 = vst [vmem:[#allocation2 + $0x7c] sm:$0xf] %v3124_v0 }
  0x7c   : > { %380 = vst [vmem:[#allocation2 + $0x8c] sm:$0xf] %v3124_v0  ;;  %381 = vst [vmem:[#allocation2 + $0x9c] sm:$0xf] %v3124_v0 }
  0x7d PF: > { %v2844_v1 = vld [vmem:[#allocation6 + $0x38] sm:$0xff]   ;;  %v2845_v2 = vld [vmem:[#allocation6 + $0x30] sm:$0xff]   ;;  %s2534_s14 = sshll.u32 %s3098_s30, 6  ;;  %v2846_v3 = vld [vmem:[#allocation6 + $0x28] sm:$0xff]   ;;  %p2487_p1 = scmp.ne.s32.totalorder %s2444_s19, 0 }
  0x7e   : > { %2631 = vmatprep.subr.bf16.mxu0 %v2844_v1  ;;  %s3371_s18 = scalar_lea.vmem %s312_s7, %s2534_s14 [#allocation3]  ;;  %v2847_v4 = vld [vmem:[#allocation6 + $0x20] sm:$0xff]   ;;  %v2848_v6 = vld [vmem:[#allocation6 + $0x18] sm:$0xff]   ;;  %v2849_v7 = vld [vmem:[#allocation6 + $0x10] sm:$0xff]  }
  0x7f   : > { %2632 = vmatpush3.bf16.msra.mxu0 %v2844_v1  ;;  %v2852_v5 = vld [vmem:[%s3371_s18] sm:$0xff]   ;;  %v2850_v8 = vld [vmem:[#allocation6 + $0x8] sm:$0xff]   ;;  %v2854_v11 = vld [vmem:[%s3371_s18 + $0x10] sm:$0xff]  }
  0x80   : > { %2633 = vmatprep.subr.bf16.mxu0 %v2845_v2  ;;  %2647 = vmatprep.mubr.bf16.mxu0 %v2852_v5  ;;  %v2851_v9 = vld [vmem:[#allocation6] sm:$0xff]   ;;  %v2853_v10 = vld [vmem:[%s3371_s18 + $0x8] sm:$0xff]   ;;  %v2855_v12 = vld [vmem:[%s3371_s18 + $0x18] sm:$0xff]  }
  0x81   : > { %v2856_v13 = vld [vmem:[%s3371_s18 + $0x20] sm:$0xff]   ;;  %v2857_v14 = vld [vmem:[%s3371_s18 + $0x28] sm:$0xff]   ;;  %v2858_v15 = vld [vmem:[%s3371_s18 + $0x30] sm:$0xff]  }
  0x82   : > { %v2859_v16 = vld [vmem:[%s3371_s18 + $0x38] sm:$0xff]   ;;  %v2860_v17 = vld [vmem:[%s3371_s18 + $0x40] sm:$0xff]   ;;  %v2861_v18 = vld [vmem:[%s3371_s18 + $0x48] sm:$0xff]  }
  0x83   : > { %2634 = vmatpush3.bf16.msra.mxu0 %v2845_v2  ;;  %v3386_v19 = vld [vmem:[%s3881_s2] ss:$0 sm:$0xff] }
  0x84   : > { %2635 = vmatprep.subr.bf16.mxu0 %v2846_v3 }
  0x87   : > { %2636 = vmatpush3.bf16.msra.mxu0 %v2846_v3 }
  0x88   : > { %2637 = vmatprep.subr.bf16.mxu0 %v2847_v4 }
  0x8b   : > { %2638 = vmatpush3.bf16.msra.mxu0 %v2847_v4 }
  0x8c   : > { %2639 = vmatprep.subr.bf16.mxu0 %v2848_v6 }
  0x8f   : > { %2640 = vmatpush3.bf16.msra.mxu0 %v2848_v6 }
  0x90   : > { %2641 = vmatprep.subr.bf16.mxu0 %v2849_v7 }
  0x93   : > { %2642 = vmatpush3.bf16.msra.mxu0 %v2849_v7 }
  0x94   : > { %2643 = vmatprep.subr.bf16.mxu0 %v2850_v8 }
  0x97   : > { %2644 = vmatpush3.bf16.msra.mxu0 %v2850_v8 }
  0x98   : > { %2645 = vmatprep.subr.bf16.mxu0 %v2851_v9 }
  0x9b   : > { %2646 = vmatpush3.bf16.msra.mxu0 %v2851_v9 }
  0x9e   : > { %2648 = vmatmul.mubr.bf16.vlgmr.msra.gmra.mxu0 %v2853_v10 }
  0x9f   : > { %2651 = vmatprep.mubr.bf16.mxu0 %v2854_v11 }
  0xa6   : > { %2652 = vmatmul.mubr.bf16.gmra.mxu0 %v2855_v12 }
  0xa7   : > { %2655 = vmatprep.mubr.bf16.mxu0 %v2856_v13 }
  0xae   : > { %2656 = vmatmul.mubr.bf16.gmra.mxu0 %v2857_v14 }
  0xaf   : > { %2659 = vmatprep.mubr.bf16.mxu0 %v2858_v15 }
  0xb6   : > { %2660 = vmatmul.mubr.bf16.gmra.mxu0 %v2859_v16 }
  0xb7   : > { %2663 = vmatprep.mubr.bf16.mxu0 %v2860_v17 }
  0xbe   : > { %2664 = vmatmul.mubr.bf16.gmra.mxu0 %v2861_v18 }
 0x15e   : > { %v2649_v20 = vpop.f32.mrf.mxu0 }
 0x15f   : > { %v579_v21 = vadd.f32 %v2649_v20, %v3386_v19 }
 0x160   : > { %v570_v22 = vpop.f32.mrf.mxu0 }
 0x161   : > { %v651_v23 = vmax.f32 %v579_v21, 0.0  ;;  %v571_v24 = vadd.f32 %v3386_v19, %v570_v22 }
 0x162   : > { %v2650_v25 = vpop.f32.mrf.mxu0 }
 0x163   : > { %v671_v26 = vmin.f32 %v651_v23, 6.0  ;;  %v649_v27 = vmax.f32 %v571_v24, 0.0  ;;  %v582_v28 = vadd.f32 %v2650_v25, %v3386_v19 }
 0x164   : > { %v573_v29 = vpop.f32.mrf.mxu0 }
 0x165   : > { %v2537_v30 = vpack.c.bf16 %v671_v26, %v671_v26  ;;  %v669_v31 = vmin.f32 %v649_v27, 6.0  ;;  %v652_v32 = vmax.f32 %v582_v28, 0.0  ;;  %v574_v33 = vadd.f32 %v3386_v19, %v573_v29 }
 0x166   : > { %v2653_v34 = vpop.f32.mrf.mxu0 }
 0x167   : > { %771 = vst [vmem:[#allocation2 + $0x14] sm:$0xf] %v2537_v30  ;;  %v2535_v35 = vpack.c.bf16 %v669_v31, %v669_v31  ;;  %v672_v36 = vmin.f32 %v652_v32, 6.0  ;;  %v650_v37 = vmax.f32 %v574_v33, 0.0  ;;  %v595_v38 = vadd.f32 %v2653_v34, %v3386_v19 }
 0x168   : > { %v586_v39 = vpop.f32.mrf.mxu0 }
 0x169   : > { %769 = vst [vmem:[#allocation2 + $0x4] sm:$0xf] %v2535_v35  ;;  %v2538_v40 = vpack.c.bf16 %v672_v36, %v672_v36  ;;  %v670_v41 = vmin.f32 %v650_v37, 6.0  ;;  %v655_v42 = vmax.f32 %v595_v38, 0.0  ;;  %v587_v43 = vadd.f32 %v3386_v19, %v586_v39 }
 0x16a   : > { %v2654_v44 = vpop.f32.mrf.mxu0 }
 0x16b   : > { %772 = vst [vmem:[#allocation2 + $0x18] sm:$0xf] %v2538_v40  ;;  %v2536_v45 = vpack.c.bf16 %v670_v41, %v670_v41  ;;  %v675_v46 = vmin.f32 %v655_v42, 6.0  ;;  %v653_v47 = vmax.f32 %v587_v43, 0.0  ;;  %v598_v48 = vadd.f32 %v2654_v44, %v3386_v19 }
 0x16c   : > { %v589_v49 = vpop.f32.mrf.mxu0 }
 0x16d   : > { %770 = vst [vmem:[#allocation2 + $0x8] sm:$0xf] %v2536_v45  ;;  %v2541_v50 = vpack.c.bf16 %v675_v46, %v675_v46  ;;  %v673_v51 = vmin.f32 %v653_v47, 6.0  ;;  %v656_v52 = vmax.f32 %v598_v48, 0.0  ;;  %v590_v53 = vadd.f32 %v3386_v19, %v589_v49 }
 0x16e   : > { %v2657_v54 = vpop.f32.mrf.mxu0 }
 0x16f   : > { %775 = vst [vmem:[#allocation2 + $0x34] sm:$0xf] %v2541_v50  ;;  %v2539_v55 = vpack.c.bf16 %v673_v51, %v673_v51  ;;  %v676_v56 = vmin.f32 %v656_v52, 6.0  ;;  %v654_v57 = vmax.f32 %v590_v53, 0.0  ;;  %v611_v58 = vadd.f32 %v2657_v54, %v3386_v19 }
 0x170   : > { %v602_v59 = vpop.f32.mrf.mxu0 }
 0x171   : > { %773 = vst [vmem:[#allocation2 + $0x24] sm:$0xf] %v2539_v55  ;;  %v2542_v60 = vpack.c.bf16 %v676_v56, %v676_v56  ;;  %v674_v61 = vmin.f32 %v654_v57, 6.0  ;;  %v659_v62 = vmax.f32 %v611_v58, 0.0  ;;  %v603_v63 = vadd.f32 %v3386_v19, %v602_v59 }
 0x172   : > { %v2658_v0 = vpop.f32.mrf.mxu0 }
 0x173   : > { %776 = vst [vmem:[#allocation2 + $0x38] sm:$0xf] %v2542_v60  ;;  %v2540_v1 = vpack.c.bf16 %v674_v61, %v674_v61  ;;  %v679_v2 = vmin.f32 %v659_v62, 6.0  ;;  %v657_v3 = vmax.f32 %v603_v63, 0.0  ;;  %v614_v4 = vadd.f32 %v2658_v0, %v3386_v19 }
 0x174   : > { %v605_v5 = vpop.f32.mrf.mxu0 }
 0x175   : > { %774 = vst [vmem:[#allocation2 + $0x28] sm:$0xf] %v2540_v1  ;;  %v2545_v6 = vpack.c.bf16 %v679_v2, %v679_v2  ;;  %v677_v7 = vmin.f32 %v657_v3, 6.0  ;;  %v660_v8 = vmax.f32 %v614_v4, 0.0  ;;  %v606_v9 = vadd.f32 %v3386_v19, %v605_v5 }
 0x176   : > { %v2661_v10 = vpop.f32.mrf.mxu0 }
 0x177   : > { %779 = vst [vmem:[#allocation2 + $0x54] sm:$0xf] %v2545_v6  ;;  %v2543_v11 = vpack.c.bf16 %v677_v7, %v677_v7  ;;  %v680_v12 = vmin.f32 %v660_v8, 6.0  ;;  %v658_v13 = vmax.f32 %v606_v9, 0.0  ;;  %v627_v14 = vadd.f32 %v2661_v10, %v3386_v19 }
 0x178   : > { %v618_v15 = vpop.f32.mrf.mxu0 }
 0x179   : > { %777 = vst [vmem:[#allocation2 + $0x44] sm:$0xf] %v2543_v11  ;;  %v2546_v16 = vpack.c.bf16 %v680_v12, %v680_v12  ;;  %v678_v17 = vmin.f32 %v658_v13, 6.0  ;;  %v663_v18 = vmax.f32 %v627_v14, 0.0  ;;  %v619_v20 = vadd.f32 %v3386_v19, %v618_v15 }
 0x17a   : > { %v2662_v21 = vpop.f32.mrf.mxu0 }
 0x17b   : > { %780 = vst [vmem:[#allocation2 + $0x58] sm:$0xf] %v2546_v16  ;;  %v2544_v22 = vpack.c.bf16 %v678_v17, %v678_v17  ;;  %v683_v23 = vmin.f32 %v663_v18, 6.0  ;;  %v661_v24 = vmax.f32 %v619_v20, 0.0  ;;  %v630_v25 = vadd.f32 %v2662_v21, %v3386_v19 }
 0x17c   : > { %v621_v26 = vpop.f32.mrf.mxu0 }
 0x17d   : > { %778 = vst [vmem:[#allocation2 + $0x48] sm:$0xf] %v2544_v22  ;;  %v2549_v27 = vpack.c.bf16 %v683_v23, %v683_v23  ;;  %v681_v28 = vmin.f32 %v661_v24, 6.0  ;;  %v664_v29 = vmax.f32 %v630_v25, 0.0  ;;  %v622_v30 = vadd.f32 %v3386_v19, %v621_v26 }
 0x17e   : > { %v2665_v31 = vpop.f32.mrf.mxu0 }
 0x17f   : > { %783 = vst [vmem:[#allocation2 + $0x74] sm:$0xf] %v2549_v27  ;;  %v2547_v32 = vpack.c.bf16 %v681_v28, %v681_v28  ;;  %v684_v33 = vmin.f32 %v664_v29, 6.0  ;;  %v662_v34 = vmax.f32 %v622_v30, 0.0  ;;  %v643_v35 = vadd.f32 %v2665_v31, %v3386_v19 }
 0x180   : > { %v634_v36 = vpop.f32.mrf.mxu0 }
 0x181   : > { %781 = vst [vmem:[#allocation2 + $0x64] sm:$0xf] %v2547_v32  ;;  %v2550_v37 = vpack.c.bf16 %v684_v33, %v684_v33  ;;  %v682_v38 = vmin.f32 %v662_v34, 6.0  ;;  %v667_v39 = vmax.f32 %v643_v35, 0.0  ;;  %v635_v40 = vadd.f32 %v3386_v19, %v634_v36 }
 0x182   : > { %v2666_v41 = vpop.f32.mrf.mxu0 }
 0x183   : > { %784 = vst [vmem:[#allocation2 + $0x78] sm:$0xf] %v2550_v37  ;;  %v2548_v42 = vpack.c.bf16 %v682_v38, %v682_v38  ;;  %v687_v43 = vmin.f32 %v667_v39, 6.0  ;;  %v665_v44 = vmax.f32 %v635_v40, 0.0  ;;  %v646_v45 = vadd.f32 %v2666_v41, %v3386_v19 }
 0x184   : > { %v637_v46 = vpop.f32.mrf.mxu0 }
 0x185   : > { %782 = vst [vmem:[#allocation2 + $0x68] sm:$0xf] %v2548_v42  ;;  %v2553_v47 = vpack.c.bf16 %v687_v43, %v687_v43  ;;  %v685_v48 = vmin.f32 %v665_v44, 6.0  ;;  %v668_v49 = vmax.f32 %v646_v45, 0.0  ;;  %v638_v50 = vadd.f32 %v3386_v19, %v637_v46 }
 0x187   : > { %787 = vst [vmem:[#allocation2 + $0x94] sm:$0xf] %v2553_v47  ;;  %v2551_v51 = vpack.c.bf16 %v685_v48, %v685_v48  ;;  %v688_v52 = vmin.f32 %v668_v49, 6.0  ;;  %v666_v53 = vmax.f32 %v638_v50, 0.0 }
 0x189   : > { %785 = vst [vmem:[#allocation2 + $0x84] sm:$0xf] %v2551_v51  ;;  %v2554_v54 = vpack.c.bf16 %v688_v52, %v688_v52  ;;  %v686_v55 = vmin.f32 %v666_v53, 6.0  ;;  %792 = sbr.rel (%p2487_p1) target bundleno = 401 (0x191), region = 72 }
 0x18b   : > { %788 = vst [vmem:[#allocation2 + $0x98] sm:$0xf] %v2554_v54  ;;  %v2552_v56 = vpack.c.bf16 %v686_v55, %v686_v55 }
 0x18d   : > { %786 = vst [vmem:[#allocation2 + $0x88] sm:$0xf] %v2552_v56 }
 0x18e   : > { %v3125_v57 = vmov 0  }
 0x18f   : > { %793 = vst [vmem:[#allocation2] sm:$0xf] %v3125_v57  ;;  %794 = vst [vmem:[#allocation2 + $0x4] sm:$0xf] %v3125_v57 }
 0x190   : > { %795 = vst [vmem:[#allocation2 + $0x8] sm:$0xf] %v3125_v57  ;;  %796 = vst [vmem:[#allocation2 + $0xc] sm:$0xf] %v3125_v57 }
 0x191 PF: > { %s797_s22 = sadd.s32 9, %s2444_s19 }
 0x192   : > { %p2488_p7 = scmp.ne.s32.totalorder %s797_s22, 17 }
 0x194   : > { %801 = sbr.rel (%p2488_p7) target bundleno = 412 (0x19c), region = 76 }
 0x199   : > { %v3126_v19 = vmov 0  }
 0x19a   : > { %803 = vst [vmem:[#allocation2 + $0x90] sm:$0xf] %v3126_v19  ;;  %804 = vst [vmem:[#allocation2 + $0x94] sm:$0xf] %v3126_v19 }
 0x19b   : > { %805 = vst [vmem:[#allocation2 + $0x98] sm:$0xf] %v3126_v19  ;;  %806 = vst [vmem:[#allocation2 + $0x9c] sm:$0xf] %v3126_v19 }
 0x19c PF: > { %v2862_v58 = vld [vmem:[#allocation9 + $0x38] sm:$0xff]   ;;  %v2863_v59 = vld [vmem:[#allocation9 + $0x30] sm:$0xff]   ;;  %v2864_v60 = vld [vmem:[#allocation9 + $0x28] sm:$0xff]   ;;  %vm921_vm0 = vcmask 1046528   ;;  %vm1063_vm1 = vcmask 1045504   ;;  %vm1991_vm2 = vcmask 1040384  }
 0x19d   : > { %2667 = vmatprep.subr.bf16.mxu1 %v2862_v58  ;;  %v2865_v61 = vld [vmem:[#allocation9 + $0x20] sm:$0xff]   ;;  %v807_v62 = vld [vmem:[#allocation2] sm:$0x8]  ;;  %v808_v63 = vld [vmem:[#allocation2 + $0x4] sm:$0xff]   ;;  %s3923_s21 = sld [smem:[#allocation17_spill]]  ;;  %s2556_s23 = sshll.u32 %s3098_s30, 4 }
 0x19e   : > { %2668 = vmatpush3.bf16.msra.mxu1 %v2862_v58  ;;  %v3412_v0 = vld [vmem:[#allocation8] ss:$0 sm:$0xff]  ;;  %v831_v1 = vunpack.c.l.bf16 %v807_v62  ;;  %v832_v2 = vunpack.c.l.bf16 %v808_v63  ;;  %v833_v3 = vunpack.c.h.bf16 %v808_v63  ;;  %v3414_v4 = vld [vmem:[#allocation8 + $0x1] ss:$0 sm:$0xff]  ;;  %v994_v5 = vld [vmem:[#allocation2 + $0xc] sm:$0x1] }
 0x19f   : > { %2669 = vmatprep.subr.bf16.mxu1 %v2863_v59  ;;  %v3416_v6 = vld [vmem:[#allocation8 + $0x2] ss:$0 sm:$0xff]  ;;  %v1002_v7 = vunpack.c.l.bf16 %v994_v5  ;;  %v1153_v8 = vld [vmem:[#allocation2 + $0x10] sm:$0x8]  ;;  %v1154_v9 = vld [vmem:[#allocation2 + $0x14] sm:$0xff]   ;;  %s3924_s30 = sld [smem:[#allocation19_spill]] }
 0x1a0   : > { %v860_v10 = vmul.f32 %v3412_v0, %v831_v1  ;;  %v861_v11 = vmul.f32 %v3412_v0, %v832_v2  ;;  %v862_v12 = vmul.f32 %v3412_v0, %v833_v3  ;;  %v889_v13 = vmul.f32 %v3414_v4, %v832_v2  ;;  %v2866_v14 = vld [vmem:[#allocation9 + $0x18] sm:$0xff]   ;;  %v3426_v20 = vld [vmem:[#allocation8 + $0x3] ss:$0 sm:$0xff]  ;;  %v3428_v29 = vld [vmem:[#allocation8 + $0x4] ss:$0 sm:$0xff]  ;;  %s2309_s14 = sshll.u32 %s3365_s17, 4  ;;  %s3813_s14 = int_to_ptr.vmem [resolvable:$true] %s2309_s14 }
 0x1a1   : > { %v890_v15 = vmul.f32 %v3414_v4, %v833_v3  ;;  %v1015_v16 = vmul.f32 %v3416_v6, %v832_v2  ;;  %v1016_v17 = vmul.f32 %v3416_v6, %v833_v3  ;;  %v1017_v18 = vmul.f32 %v3416_v6, %v1002_v7  ;;  %v1363_v34 = vld [vmem:[#allocation2 + $0x1c] sm:$0x1]  ;;  %v3433_v35 = vld [vmem:[#allocation8 + $0x5] ss:$0 sm:$0xff]  ;;  %v1521_v49 = vld [vmem:[#allocation2 + $0x20] sm:$0x8] }
 0x1a2   : > { %2670 = vmatpush3.bf16.msra.mxu1 %v2863_v59  ;;  %v922_v21 = vrot.slane %v889_v13, 1  ;;  %v1177_v22 = vunpack.c.l.bf16 %v1153_v8  ;;  %v1178_v23 = vunpack.c.l.bf16 %v1154_v9  ;;  %v1179_v24 = vunpack.c.h.bf16 %v1154_v9  ;;  %v2867_v36 = vld [vmem:[#allocation9 + $0x10] sm:$0xff]   ;;  %v2868_v55 = vld [vmem:[#allocation9 + $0x8] sm:$0xff]   ;;  %v1731_v2 = vld [vmem:[#allocation2 + $0x2c] sm:$0x1]  ;;  %s3925_s27 = sld [smem:[#allocation26_spill]] }
 0x1a3   : > { %2671 = vmatprep.subr.bf16.mxu1 %v2864_v60  ;;  %v923_v25 = vrot.slane %v890_v15, 1  ;;  %v1064_v26 = vrot.slane %v1015_v16, 2  ;;  %v1065_v27 = vrot.slane %v1016_v17, 2  ;;  %v1067_v28 = vrot.slane %v1017_v18, 2  ;;  %v1522_v54 = vld [vmem:[#allocation2 + $0x24] sm:$0xff]   ;;  %s2529_s7 = sshll.u32 %s3923_s21, 5 }
 0x1a4   : > { %v970_v30 = vadd.f32 %v922_v21, %v860_v10  ;;  %v1206_v31 = vmul.f32 %v3426_v20, %v1177_v22  ;;  %v1207_v32 = vmul.f32 %v3426_v20, %v1178_v23  ;;  %v1208_v33 = vmul.f32 %v3426_v20, %v1179_v24  ;;  %v3443_v59 = vld [vmem:[#allocation8 + $0x6] ss:$0 sm:$0xff]  ;;  %v3446_v1 = vld [vmem:[#allocation8 + $0x7] ss:$0 sm:$0xff]  ;;  %v3450_v13 = vld [vmem:[#allocation8 + $0x8] ss:$0 sm:$0xff]  ;;  %s2306_s19 = sadd.s32 %s2556_s23, %s2529_s7 }
 0x1a5   : > { %v924_v37 = vsel %vm921_vm0, %v922_v21, %v923_v25  ;;  %v972_v38 = vadd.f32 %v923_v25, %v862_v12  ;;  %v1066_v39 = vsel %vm1063_vm1, %v1064_v26, %v1065_v27  ;;  %v1068_v40 = vsel %vm1063_vm1, %v1065_v27, %v1067_v28  ;;  %v810_v21 = vld [vmem:[#allocation2 + $0x10] sm:$0x8]  ;;  %s2530_s16 = sshll.u32 %s2306_s19, 7  ;;  %s3819_s3 = scalar_lea.sflag [#allocation5], %s352_s8 }
 0x1a6   : > { %2672 = vmatpush3.bf16.msra.mxu1 %v2864_v60  ;;  %v971_v41 = vadd.f32 %v924_v37, %v861_v11  ;;  %v1128_v42 = vadd.f32 %v1064_v26, %v970_v30  ;;  %v1259_v43 = vmul.f32 %v3428_v29, %v1178_v23  ;;  %v1260_v44 = vmul.f32 %v3428_v29, %v1179_v24  ;;  %s2986_s5 = scalar_lea.vmem %s3813_s14, 2048  ;;  %p3927_p11 = scmp.ne.s32.totalorder %s3924_s30, 0 }
 0x1a7   : > { %2673 = vmatprep.subr.bf16.mxu1 %v2865_v61  ;;  %v1130_v45 = vadd.f32 %v1068_v40, %v972_v38  ;;  %v1371_v46 = vunpack.c.l.bf16 %v1363_v34  ;;  %v1384_v47 = vmul.f32 %v3433_v35, %v1178_v23  ;;  %v1385_v48 = vmul.f32 %v3433_v35, %v1179_v24  ;;  %p2987_p9 = scmp.ne.s32.totalorder %s3813_s14, %s2986_s5  ;;  %s3127_s9 = smov [#allocation11]  }
 0x1a8   : > { %v1129_v50 = vadd.f32 %v1066_v39, %v971_v41  ;;  %v1230_v51 = vadd.f32 %v1206_v31, %v1128_v42  ;;  %v1291_v52 = vrot.slane %v1259_v43, 1  ;;  %v1292_v53 = vrot.slane %v1260_v44, 1  ;;  %v811_v31 = vld [vmem:[#allocation2 + $0x14] sm:$0xff]   ;;  %v3463_v42 = vld [vmem:[%s3883_s4] ss:$0 sm:$0xff]  ;;  %s3926_s22 = smov %s3925_s27  ;;  %s3811_s20 = scalar_lea.hbm %s3925_s27, %s2530_s16 }
 0x1a9   : > { %v1232_v56 = vadd.f32 %v1208_v33, %v1130_v45  ;;  %v1386_v57 = vmul.f32 %v3433_v35, %v1371_v46  ;;  %v1432_v19 = vrot.slane %v1384_v47, 2  ;;  %v1433_v58 = vrot.slane %v1385_v48, 2  ;;  %p2988_p6 = pnand %p2987_p9, %p3927_p11  ;;  %s2990_s12 = sshll.u32 %s3127_s9, 4  ;;  %s2991_s12 = int_to_ptr.vmem [resolvable:$false] %s2990_s12 }
 0x1aa   : > { %2674 = vmatpush3.bf16.msra.mxu1 %v2865_v61  ;;  %v1231_v60 = vadd.f32 %v1207_v32, %v1129_v50  ;;  %v1293_v61 = vsel %vm921_vm0, %v1291_v52, %v1292_v53  ;;  %v1339_v62 = vadd.f32 %v1291_v52, %v1230_v51  ;;  %v1545_v63 = vunpack.c.l.bf16 %v1521_v49  ;;  %v995_v50 = vld [vmem:[#allocation2 + $0x1c] sm:$0x1]  ;;  %s2992_s15 = scalar_lea.vmem %s2991_s12, 4096  ;;  %p2993_p12 = scmp.lt.s32.totalorder %s3813_s14, %s2991_s12 }
 0x1ab   : > { %2675 = vmatprep.subr.bf16.mxu1 %v2866_v14  ;;  %v1341_v3 = vadd.f32 %v1292_v53, %v1232_v56  ;;  %v1434_v5 = vsel %vm1063_vm1, %v1432_v19, %v1433_v58  ;;  %v1435_v7 = vrot.slane %v1386_v57, 2  ;;  %v1546_v8 = vunpack.c.l.bf16 %v1522_v54  ;;  %p2989_p13 = pneg %p2988_p6  ;;  %p2994_p0 = scmp.lt.s32.totalorder %s2992_s15, %s2986_s5 }
 0x1ac   : > { %v1340_v9 = vadd.f32 %v1293_v61, %v1231_v60  ;;  %v1496_v10 = vadd.f32 %v1432_v19, %v1339_v62  ;;  %v1547_v11 = vunpack.c.h.bf16 %v1522_v54  ;;  %v1574_v12 = vmul.f32 %v3443_v59, %v1545_v63 }
 0x1ad   : > { %v1436_v15 = vsel %vm1063_vm1, %v1433_v58, %v1435_v7  ;;  %v1575_v16 = vmul.f32 %v3443_v59, %v1546_v8  ;;  %v1627_v17 = vmul.f32 %v3446_v1, %v1546_v8  ;;  %v1739_v18 = vunpack.c.l.bf16 %v1731_v2  ;;  %p2995_p2 = por %p2994_p0, %p2993_p12 }
 0x1ae   : > { %2676 = vmatpush3.bf16.msra.mxu1 %v2866_v14  ;;  %v2869_v14 = vld [vmem:[#allocation9] sm:$0xff]   ;;  %v1497_v22 = vadd.f32 %v1434_v5, %v1340_v9  ;;  %v1498_v23 = vadd.f32 %v1436_v15, %v1341_v3  ;;  %v1576_v24 = vmul.f32 %v3443_v59, %v1547_v11  ;;  %v1598_v25 = vadd.f32 %v1574_v12, %v1496_v10 }
 0x1af   : > { %2677 = vmatprep.subr.bf16.mxu1 %v2867_v36  ;;  %v1628_v26 = vmul.f32 %v3446_v1, %v1547_v11  ;;  %v1659_v27 = vrot.slane %v1627_v17, 1  ;;  %v1752_v28 = vmul.f32 %v3450_v13, %v1546_v8  ;;  %v1753_v30 = vmul.f32 %v3450_v13, %v1547_v11  ;;  %v1157_v17 = vld [vmem:[#allocation2 + $0x24] sm:$0xff]   ;;  %p2996_p4 = pnand %p2995_p2, %p2989_p13 }
 0x1b0   : > { %v1599_v32 = vadd.f32 %v1575_v16, %v1497_v22  ;;  %v1600_v33 = vadd.f32 %v1576_v24, %v1498_v23  ;;  %v1754_v34 = vmul.f32 %v3450_v13, %v1739_v18  ;;  %v835_v43 = vunpack.c.l.bf16 %v811_v31  ;;  %v1156_v16 = vld [vmem:[#allocation2 + $0x20] sm:$0x8]  ;;  %v1364_v24 = vld [vmem:[#allocation2 + $0x2c] sm:$0x1] }
 0x1b1   : > { %v1660_v37 = vrot.slane %v1628_v26, 1  ;;  %v1707_v38 = vadd.f32 %v1659_v27, %v1598_v25  ;;  %v1800_v39 = vrot.slane %v1752_v28, 2  ;;  %v1801_v40 = vrot.slane %v1753_v30, 2 }
 0x1b2   : > { %2678 = vmatpush3.bf16.msra.mxu1 %v2867_v36  ;;  %v834_v36 = vunpack.c.l.bf16 %v810_v21  ;;  %v1803_v41 = vrot.slane %v1754_v34, 2  ;;  %v836_v44 = vunpack.c.h.bf16 %v811_v31  ;;  %v864_v53 = vmul.f32 %v3412_v0, %v835_v43 }
 0x1b3   : > { %2679 = vmatprep.subr.bf16.mxu1 %v2868_v55  ;;  %v1661_v46 = vsel %vm921_vm0, %v1659_v27, %v1660_v37  ;;  %v1709_v47 = vadd.f32 %v1660_v37, %v1600_v33  ;;  %v1802_v48 = vsel %vm1063_vm1, %v1800_v39, %v1801_v40  ;;  %v1864_v49 = vadd.f32 %v1800_v39, %v1707_v38 }
 0x1b4   : > { %v863_v45 = vmul.f32 %v3412_v0, %v834_v36  ;;  %v1708_v51 = vadd.f32 %v1661_v46, %v1599_v32  ;;  %v1804_v52 = vsel %vm1063_vm1, %v1801_v40, %v1803_v41  ;;  %v865_v54 = vmul.f32 %v3412_v0, %v836_v44 }
 0x1b5   : > { %v1895_v56 = vadd.f32 %v3463_v42, %v1864_v49  ;;  %v891_v57 = vmul.f32 %v3414_v4, %v835_v43  ;;  %v892_v19 = vmul.f32 %v3414_v4, %v836_v44  ;;  %v1003_v60 = vunpack.c.l.bf16 %v995_v50 }
 0x1b6   : > { %2680 = vmatpush3.bf16.msra.mxu1 %v2868_v55  ;;  %v1866_v55 = vadd.f32 %v1804_v52, %v1709_v47  ;;  %v1865_v58 = vadd.f32 %v1802_v48, %v1708_v51  ;;  %v1018_v61 = vmul.f32 %v3416_v6, %v835_v43  ;;  %v1019_v62 = vmul.f32 %v3416_v6, %v836_v44  ;;  %v1524_v48 = vld [vmem:[#allocation2 + $0x30] sm:$0x8] }
 0x1b7   : > { %2681 = vmatprep.subr.bf16.mxu1 %v2869_v14  ;;  %v1919_v2 = vmax.f32 %v1895_v56, 0.0  ;;  %v925_v3 = vrot.slane %v891_v57, 1  ;;  %v926_v5 = vrot.slane %v892_v19, 1  ;;  %v1020_v8 = vmul.f32 %v3416_v6, %v1003_v60 }
 0x1b8   : > { %v1897_v63 = vadd.f32 %v3463_v42, %v1866_v55  ;;  %v1896_v7 = vadd.f32 %v3463_v42, %v1865_v58  ;;  %v1069_v9 = vrot.slane %v1018_v61, 2  ;;  %v1070_v10 = vrot.slane %v1019_v62, 2 }
 0x1b9   : > { %v1943_v12 = vmin.f32 %v1919_v2, 6.0  ;;  %v973_v15 = vadd.f32 %v925_v3, %v863_v45  ;;  %v975_v22 = vadd.f32 %v926_v5, %v865_v54  ;;  %v1072_v27 = vrot.slane %v1020_v8, 2 }
 0x1ba   : > { %2682 = vmatpush3.bf16.msra.mxu1 %v2869_v14  ;;  %v1921_v11 = vmax.f32 %v1897_v63, 0.0  ;;  %v927_v14 = vsel %vm921_vm0, %v925_v3, %v926_v5  ;;  %v1920_v18 = vmax.f32 %v1896_v7, 0.0  ;;  %v1071_v23 = vsel %vm1063_vm1, %v1069_v9, %v1070_v10 }
 0x1bb   : > { %v974_v21 = vadd.f32 %v927_v14, %v864_v53  ;;  %v1992_v26 = vrot.slane %v1943_v12, 7  ;;  %v1131_v28 = vadd.f32 %v1069_v9, %v973_v15  ;;  %v1180_v32 = vunpack.c.l.bf16 %v1156_v16  ;;  %v1525_v53 = vld [vmem:[#allocation2 + $0x34] sm:$0xff]   ;;  %v1732_v15 = vld [vmem:[#allocation2 + $0x3c] sm:$0x1] }
 0x1bc   : > { %v1945_v25 = vmin.f32 %v1921_v11, 6.0  ;;  %v1944_v30 = vmin.f32 %v1920_v18, 6.0  ;;  %v1181_v33 = vunpack.c.l.bf16 %v1157_v17  ;;  %v1073_v36 = vsel %vm1063_vm1, %v1070_v10, %v1072_v27 }
 0x1bd   : > { %v1132_v31 = vadd.f32 %v1071_v23, %v974_v21  ;;  %v1182_v37 = vunpack.c.h.bf16 %v1157_v17  ;;  %v1372_v38 = vunpack.c.l.bf16 %v1364_v24  ;;  %v1133_v40 = vadd.f32 %v1073_v36, %v975_v22  ;;  %v813_v22 = vld [vmem:[#allocation2 + $0x20] sm:$0x8] }
 0x1be   : > { %v1995_v34 = vrot.slane %v1945_v25, 7  ;;  %v1993_v39 = vrot.slane %v1944_v30, 7  ;;  %v1209_v41 = vmul.f32 %v3426_v20, %v1180_v32  ;;  %v1210_v43 = vmul.f32 %v3426_v20, %v1181_v33  ;;  %v814_v32 = vld [vmem:[#allocation2 + $0x24] sm:$0xff]  }
 0x1bf   : > { %v1211_v44 = vmul.f32 %v3426_v20, %v1182_v37  ;;  %v1261_v45 = vmul.f32 %v3428_v29, %v1181_v33  ;;  %v1262_v46 = vmul.f32 %v3428_v29, %v1182_v37  ;;  %v1387_v47 = vmul.f32 %v3433_v35, %v1181_v33 }
 0x1c0   : > { %v1994_v49 = vsel %vm1991_vm2, %v1992_v26, %v1993_v39  ;;  %v1996_v50 = vsel %vm1991_vm2, %v1993_v39, %v1995_v34  ;;  %v1233_v51 = vadd.f32 %v1209_v41, %v1131_v28  ;;  %v1234_v52 = vadd.f32 %v1210_v43, %v1132_v31 }
 0x1c1   : > { %v2048_v54 = vpack.c.bf16 %v1996_v50, %v1994_v49  ;;  %v1235_v55 = vadd.f32 %v1211_v44, %v1133_v40  ;;  %v1294_v56 = vrot.slane %v1261_v45, 1  ;;  %v1295_v57 = vrot.slane %v1262_v46, 1 }
 0x1c2   : > { %v1388_v19 = vmul.f32 %v3433_v35, %v1182_v37  ;;  %v1389_v58 = vmul.f32 %v3433_v35, %v1372_v38  ;;  %v1437_v60 = vrot.slane %v1387_v47, 2  ;;  %v1548_v61 = vunpack.c.l.bf16 %v1524_v48  ;;  %v996_v47 = vld [vmem:[#allocation2 + $0x2c] sm:$0x1] }
 0x1c3   : > { %2683 = vmatprep.mubr.bf16.mxu1 %v2048_v54  ;;  %v1296_v62 = vsel %vm921_vm0, %v1294_v56, %v1295_v57  ;;  %v1342_v63 = vadd.f32 %v1294_v56, %v1233_v51  ;;  %v1344_v2 = vadd.f32 %v1295_v57, %v1235_v55  ;;  %v1549_v3 = vunpack.c.l.bf16 %v1525_v53 }
 0x1c4   : > { %v1343_v5 = vadd.f32 %v1296_v62, %v1234_v52  ;;  %v1438_v7 = vrot.slane %v1388_v19, 2  ;;  %v1440_v8 = vrot.slane %v1389_v58, 2  ;;  %v1550_v9 = vunpack.c.h.bf16 %v1525_v53 }
 0x1c5   : > { %v1499_v10 = vadd.f32 %v1437_v60, %v1342_v63  ;;  %v1577_v11 = vmul.f32 %v3443_v59, %v1548_v61  ;;  %v1578_v12 = vmul.f32 %v3443_v59, %v1549_v3  ;;  %v1629_v14 = vmul.f32 %v3446_v1, %v1549_v3 }
 0x1c6   : > { %v1439_v16 = vsel %vm1063_vm1, %v1437_v60, %v1438_v7  ;;  %v1441_v17 = vsel %vm1063_vm1, %v1438_v7, %v1440_v8  ;;  %v1579_v18 = vmul.f32 %v3443_v59, %v1550_v9  ;;  %v1630_v21 = vmul.f32 %v3446_v1, %v1550_v9 }
 0x1c7   : > { %v1500_v23 = vadd.f32 %v1439_v16, %v1343_v5  ;;  %v1501_v24 = vadd.f32 %v1441_v17, %v1344_v2  ;;  %v1601_v25 = vadd.f32 %v1577_v11, %v1499_v10  ;;  %v1662_v26 = vrot.slane %v1629_v14, 1 }
 0x1c8   : > { %v1663_v27 = vrot.slane %v1630_v21, 1  ;;  %v1740_v28 = vunpack.c.l.bf16 %v1732_v15  ;;  %v1755_v30 = vmul.f32 %v3450_v13, %v1549_v3  ;;  %v1756_v31 = vmul.f32 %v3450_v13, %v1550_v9 }
 0x1c9   : > { %v1602_v33 = vadd.f32 %v1578_v12, %v1500_v23  ;;  %v1603_v34 = vadd.f32 %v1579_v18, %v1501_v24  ;;  %v1710_v36 = vadd.f32 %v1662_v26, %v1601_v25  ;;  %v837_v37 = vunpack.c.l.bf16 %v813_v22  ;;  %v1159_v12 = vld [vmem:[#allocation2 + $0x30] sm:$0x8]  ;;  %v1160_v24 = vld [vmem:[#allocation2 + $0x34] sm:$0xff]  }
 0x1ca   : > { %v1664_v38 = vsel %vm921_vm0, %v1662_v26, %v1663_v27  ;;  %v1757_v39 = vmul.f32 %v3450_v13, %v1740_v28  ;;  %v1805_v40 = vrot.slane %v1755_v30, 2  ;;  %v1806_v41 = vrot.slane %v1756_v31, 2  ;;  %v1365_v30 = vld [vmem:[#allocation2 + $0x3c] sm:$0x1]  ;;  %v1527_v31 = vld [vmem:[#allocation2 + $0x40] sm:$0x8] }
 0x1cb   : > { %v1711_v43 = vadd.f32 %v1664_v38, %v1602_v33  ;;  %v1712_v44 = vadd.f32 %v1663_v27, %v1603_v34  ;;  %v838_v45 = vunpack.c.l.bf16 %v814_v32  ;;  %v839_v46 = vunpack.c.h.bf16 %v814_v32 }
 0x1cc   : > { %v1807_v48 = vsel %vm1063_vm1, %v1805_v40, %v1806_v41  ;;  %v1808_v49 = vrot.slane %v1757_v39, 2  ;;  %v1867_v50 = vadd.f32 %v1805_v40, %v1710_v36  ;;  %v866_v51 = vmul.f32 %v3412_v0, %v837_v37 }
 0x1cd   : > { %v1868_v52 = vadd.f32 %v1807_v48, %v1711_v43  ;;  %v867_v53 = vmul.f32 %v3412_v0, %v838_v45  ;;  %v868_v54 = vmul.f32 %v3412_v0, %v839_v46  ;;  %v893_v55 = vmul.f32 %v3414_v4, %v838_v45 }
 0x1ce   : > { %v1809_v56 = vsel %vm1063_vm1, %v1806_v41, %v1808_v49  ;;  %v1898_v57 = vadd.f32 %v3463_v42, %v1867_v50  ;;  %v894_v19 = vmul.f32 %v3414_v4, %v839_v46  ;;  %v1004_v58 = vunpack.c.l.bf16 %v996_v47 }
 0x1cf   : > { %v1869_v60 = vadd.f32 %v1809_v56, %v1712_v44  ;;  %v1899_v61 = vadd.f32 %v3463_v42, %v1868_v52  ;;  %v928_v62 = vrot.slane %v893_v55, 1  ;;  %v1021_v63 = vmul.f32 %v3416_v6, %v838_v45 }
 0x1d0   : > { %v1922_v2 = vmax.f32 %v1898_v57, 0.0  ;;  %v929_v3 = vrot.slane %v894_v19, 1  ;;  %v1022_v5 = vmul.f32 %v3416_v6, %v839_v46  ;;  %v1023_v7 = vmul.f32 %v3416_v6, %v1004_v58 }
 0x1d1   : > { %v1900_v8 = vadd.f32 %v3463_v42, %v1869_v60  ;;  %v1923_v9 = vmax.f32 %v1899_v61, 0.0  ;;  %v976_v10 = vadd.f32 %v928_v62, %v866_v51  ;;  %v1074_v11 = vrot.slane %v1021_v63, 2 }
 0x1d2   : > { %v1946_v14 = vmin.f32 %v1922_v2, 6.0  ;;  %v930_v15 = vsel %vm921_vm0, %v928_v62, %v929_v3  ;;  %v978_v16 = vadd.f32 %v929_v3, %v868_v54  ;;  %v1075_v17 = vrot.slane %v1022_v5, 2  ;;  %v1528_v54 = vld [vmem:[#allocation2 + $0x44] sm:$0xff]  }
 0x1d3   : > { %v1924_v18 = vmax.f32 %v1900_v8, 0.0  ;;  %v1947_v21 = vmin.f32 %v1923_v9, 6.0  ;;  %v977_v22 = vadd.f32 %v930_v15, %v867_v53  ;;  %v1077_v23 = vrot.slane %v1023_v7, 2  ;;  %v1733_v7 = vld [vmem:[#allocation2 + $0x4c] sm:$0x1] }
 0x1d4   : > { %v1997_v25 = vrot.slane %v1946_v14, 7  ;;  %v1076_v26 = vsel %vm1063_vm1, %v1074_v11, %v1075_v17  ;;  %v1134_v27 = vadd.f32 %v1074_v11, %v976_v10  ;;  %v1183_v28 = vunpack.c.l.bf16 %v1159_v12 }
 0x1d5   : > { %v1948_v32 = vmin.f32 %v1924_v18, 6.0  ;;  %v1998_v33 = vrot.slane %v1947_v21, 7  ;;  %v1078_v34 = vsel %vm1063_vm1, %v1075_v17, %v1077_v23  ;;  %v1135_v36 = vadd.f32 %v1076_v26, %v977_v22  ;;  %v816_v23 = vld [vmem:[#allocation2 + $0x30] sm:$0x8] }
 0x1d6   : > { %v1136_v37 = vadd.f32 %v1078_v34, %v978_v16  ;;  %v1184_v38 = vunpack.c.l.bf16 %v1160_v24  ;;  %v1185_v39 = vunpack.c.h.bf16 %v1160_v24  ;;  %v1212_v40 = vmul.f32 %v3426_v20, %v1183_v28 }
 0x1d7   : > { %v1999_v41 = vsel %vm1991_vm2, %v1997_v25, %v1998_v33  ;;  %v2000_v43 = vrot.slane %v1948_v32, 7  ;;  %v1373_v44 = vunpack.c.l.bf16 %v1365_v30  ;;  %v1551_v45 = vunpack.c.l.bf16 %v1527_v31 }
 0x1d8   : > { %v1213_v46 = vmul.f32 %v3426_v20, %v1184_v38  ;;  %v1214_v47 = vmul.f32 %v3426_v20, %v1185_v39  ;;  %v1236_v48 = vadd.f32 %v1212_v40, %v1134_v27  ;;  %v1263_v49 = vmul.f32 %v3428_v29, %v1184_v38 }
 0x1d9   : > { %v2001_v50 = vsel %vm1991_vm2, %v1998_v33, %v2000_v43  ;;  %v1264_v51 = vmul.f32 %v3428_v29, %v1185_v39  ;;  %v1390_v52 = vmul.f32 %v3433_v35, %v1184_v38  ;;  %v1391_v53 = vmul.f32 %v3433_v35, %v1185_v39  ;;  %v817_v33 = vld [vmem:[#allocation2 + $0x34] sm:$0xff]  }
 0x1da   : > { %v2049_v55 = vpack.c.bf16 %v2001_v50, %v1999_v41  ;;  %v1237_v56 = vadd.f32 %v1213_v46, %v1135_v36  ;;  %v1238_v57 = vadd.f32 %v1214_v47, %v1136_v37  ;;  %v1297_v19 = vrot.slane %v1263_v49, 1 }
 0x1db   : > { %v1298_v58 = vrot.slane %v1264_v51, 1  ;;  %v1392_v60 = vmul.f32 %v3433_v35, %v1373_v44  ;;  %v1442_v61 = vrot.slane %v1390_v52, 2  ;;  %v1443_v62 = vrot.slane %v1391_v53, 2 }
 0x1dc   : > { %2684 = vmatmul.mubr.bf16.vlgmr.msra.gmra.mxu1 %v2049_v55  ;;  %v1345_v63 = vadd.f32 %v1297_v19, %v1236_v48  ;;  %v1552_v2 = vunpack.c.l.bf16 %v1528_v54  ;;  %v1553_v3 = vunpack.c.h.bf16 %v1528_v54  ;;  %v1580_v5 = vmul.f32 %v3443_v59, %v1551_v45  ;;  %v997_v48 = vld [vmem:[#allocation2 + $0x3c] sm:$0x1] }
 0x1dd   : > { %v1299_v8 = vsel %vm921_vm0, %v1297_v19, %v1298_v58  ;;  %v1347_v9 = vadd.f32 %v1298_v58, %v1238_v57  ;;  %v1444_v10 = vsel %vm1063_vm1, %v1442_v61, %v1443_v62  ;;  %v1445_v11 = vrot.slane %v1392_v60, 2 }
 0x1de   : > { %v1346_v12 = vadd.f32 %v1299_v8, %v1237_v56  ;;  %v1502_v14 = vadd.f32 %v1442_v61, %v1345_v63  ;;  %v1581_v15 = vmul.f32 %v3443_v59, %v1552_v2  ;;  %v1582_v16 = vmul.f32 %v3443_v59, %v1553_v3 }
 0x1df   : > { %v1446_v17 = vsel %vm1063_vm1, %v1443_v62, %v1445_v11  ;;  %v1631_v18 = vmul.f32 %v3446_v1, %v1552_v2  ;;  %v1632_v21 = vmul.f32 %v3446_v1, %v1553_v3  ;;  %v1741_v22 = vunpack.c.l.bf16 %v1733_v7 }
 0x1e0   : > { %v1503_v24 = vadd.f32 %v1444_v10, %v1346_v12  ;;  %v1504_v25 = vadd.f32 %v1446_v17, %v1347_v9  ;;  %v1604_v26 = vadd.f32 %v1580_v5, %v1502_v14  ;;  %v1758_v27 = vmul.f32 %v3450_v13, %v1552_v2  ;;  %v1162_v14 = vld [vmem:[#allocation2 + $0x40] sm:$0x8] }
 0x1e1   : > { %v1665_v28 = vrot.slane %v1631_v18, 1  ;;  %v1666_v30 = vrot.slane %v1632_v21, 1  ;;  %v1759_v31 = vmul.f32 %v3450_v13, %v1553_v3  ;;  %v1760_v32 = vmul.f32 %v3450_v13, %v1741_v22  ;;  %v1163_v21 = vld [vmem:[#allocation2 + $0x44] sm:$0xff]  }
 0x1e2   : > { %v1605_v34 = vadd.f32 %v1581_v15, %v1503_v24  ;;  %v1606_v36 = vadd.f32 %v1582_v16, %v1504_v25  ;;  %v1810_v37 = vrot.slane %v1758_v27, 2  ;;  %v840_v38 = vunpack.c.l.bf16 %v816_v23 }
 0x1e3   : > { %v1667_v39 = vsel %vm921_vm0, %v1665_v28, %v1666_v30  ;;  %v1713_v40 = vadd.f32 %v1665_v28, %v1604_v26  ;;  %v1811_v41 = vrot.slane %v1759_v31, 2  ;;  %v1813_v43 = vrot.slane %v1760_v32, 2  ;;  %v1366_v26 = vld [vmem:[#allocation2 + $0x4c] sm:$0x1] }
 0x1e4   : > { %v1714_v44 = vadd.f32 %v1667_v39, %v1605_v34  ;;  %v1715_v45 = vadd.f32 %v1666_v30, %v1606_v36  ;;  %v841_v46 = vunpack.c.l.bf16 %v817_v33  ;;  %v842_v47 = vunpack.c.h.bf16 %v817_v33 }
 0x1e5   : > { %v1812_v49 = vsel %vm1063_vm1, %v1810_v37, %v1811_v41  ;;  %v1814_v50 = vsel %vm1063_vm1, %v1811_v41, %v1813_v43  ;;  %v1870_v51 = vadd.f32 %v1810_v37, %v1713_v40  ;;  %v869_v52 = vmul.f32 %v3412_v0, %v840_v38 }
 0x1e6   : > { %v1871_v53 = vadd.f32 %v1812_v49, %v1714_v44  ;;  %v1872_v54 = vadd.f32 %v1814_v50, %v1715_v45  ;;  %v870_v55 = vmul.f32 %v3412_v0, %v841_v46  ;;  %v871_v56 = vmul.f32 %v3412_v0, %v842_v47 }
 0x1e7   : > { %v1901_v57 = vadd.f32 %v3463_v42, %v1870_v51  ;;  %v895_v19 = vmul.f32 %v3414_v4, %v841_v46  ;;  %v896_v58 = vmul.f32 %v3414_v4, %v842_v47  ;;  %v1005_v60 = vunpack.c.l.bf16 %v997_v48  ;;  %v1531_v51 = vld [vmem:[#allocation2 + $0x54] sm:$0xff]  }
 0x1e8   : > { %v1902_v61 = vadd.f32 %v3463_v42, %v1871_v53  ;;  %v1903_v62 = vadd.f32 %v3463_v42, %v1872_v54  ;;  %v1024_v63 = vmul.f32 %v3416_v6, %v841_v46  ;;  %v1025_v2 = vmul.f32 %v3416_v6, %v842_v47  ;;  %v1530_v46 = vld [vmem:[#allocation2 + $0x50] sm:$0x8] }
 0x1e9   : > { %v1925_v3 = vmax.f32 %v1901_v57, 0.0  ;;  %v931_v5 = vrot.slane %v895_v19, 1  ;;  %v932_v7 = vrot.slane %v896_v58, 1  ;;  %v1026_v8 = vmul.f32 %v3416_v6, %v1005_v60 }
 0x1ea   : > { %v1926_v9 = vmax.f32 %v1902_v61, 0.0  ;;  %v1927_v10 = vmax.f32 %v1903_v62, 0.0  ;;  %v1079_v11 = vrot.slane %v1024_v63, 2  ;;  %v1080_v12 = vrot.slane %v1025_v2, 2 }
 0x1eb   : > { %v1949_v15 = vmin.f32 %v1925_v3, 6.0  ;;  %v933_v16 = vsel %vm921_vm0, %v931_v5, %v932_v7  ;;  %v979_v17 = vadd.f32 %v931_v5, %v869_v52  ;;  %v981_v18 = vadd.f32 %v932_v7, %v871_v56 }
 0x1ec   : > { %v1950_v22 = vmin.f32 %v1926_v9, 6.0  ;;  %v1951_v23 = vmin.f32 %v1927_v10, 6.0  ;;  %v980_v24 = vadd.f32 %v933_v16, %v870_v55  ;;  %v1081_v25 = vsel %vm1063_vm1, %v1079_v11, %v1080_v12 }
 0x1ed   : > { %v2002_v27 = vrot.slane %v1949_v15, 7  ;;  %v1082_v28 = vrot.slane %v1026_v8, 2  ;;  %v1137_v30 = vadd.f32 %v1079_v11, %v979_v17  ;;  %v1186_v31 = vunpack.c.l.bf16 %v1162_v14  ;;  %v1734_v8 = vld [vmem:[#allocation2 + $0x5c] sm:$0x1] }
 0x1ee   : > { %v2003_v32 = vrot.slane %v1950_v22, 7  ;;  %v2005_v33 = vrot.slane %v1951_v23, 7  ;;  %v1138_v34 = vadd.f32 %v1081_v25, %v980_v24  ;;  %v1187_v36 = vunpack.c.l.bf16 %v1163_v21  ;;  %v819_v24 = vld [vmem:[#allocation2 + $0x40] sm:$0x8] }
 0x1ef   : > { %v1083_v37 = vsel %vm1063_vm1, %v1080_v12, %v1082_v28  ;;  %v1188_v38 = vunpack.c.h.bf16 %v1163_v21  ;;  %v1215_v39 = vmul.f32 %v3426_v20, %v1186_v31  ;;  %v1374_v40 = vunpack.c.l.bf16 %v1366_v26 }
 0x1f0   : > { %v2004_v41 = vsel %vm1991_vm2, %v2002_v27, %v2003_v32  ;;  %v2006_v43 = vsel %vm1991_vm2, %v2003_v32, %v2005_v33  ;;  %v1139_v44 = vadd.f32 %v1083_v37, %v981_v18  ;;  %v1216_v45 = vmul.f32 %v3426_v20, %v1187_v36 }
 0x1f1   : > { %v2050_v47 = vpack.c.bf16 %v2006_v43, %v2004_v41  ;;  %v1217_v48 = vmul.f32 %v3426_v20, %v1188_v38  ;;  %v1239_v49 = vadd.f32 %v1215_v39, %v1137_v30  ;;  %v1265_v50 = vmul.f32 %v3428_v29, %v1187_v36 }
 0x1f2   : > { %v1240_v52 = vadd.f32 %v1216_v45, %v1138_v34  ;;  %v1266_v53 = vmul.f32 %v3428_v29, %v1188_v38  ;;  %v1393_v54 = vmul.f32 %v3433_v35, %v1187_v36  ;;  %v1394_v55 = vmul.f32 %v3433_v35, %v1188_v38  ;;  %v820_v34 = vld [vmem:[#allocation2 + $0x44] sm:$0xff]  }
 0x1f3   : > { %2687 = vmatprep.mubr.bf16.mxu1 %v2050_v47  ;;  %v1241_v56 = vadd.f32 %v1217_v48, %v1139_v44  ;;  %v1300_v57 = vrot.slane %v1265_v50, 1  ;;  %v1395_v19 = vmul.f32 %v3433_v35, %v1374_v40  ;;  %v1554_v58 = vunpack.c.l.bf16 %v1530_v46  ;;  %v998_v40 = vld [vmem:[#allocation2 + $0x4c] sm:$0x1] }
 0x1f4   : > { %v1301_v60 = vrot.slane %v1266_v53, 1  ;;  %v1447_v61 = vrot.slane %v1393_v54, 2  ;;  %v1448_v62 = vrot.slane %v1394_v55, 2  ;;  %v1555_v63 = vunpack.c.l.bf16 %v1531_v51 }
 0x1f5   : > { %v1348_v2 = vadd.f32 %v1300_v57, %v1239_v49  ;;  %v1450_v3 = vrot.slane %v1395_v19, 2  ;;  %v1556_v5 = vunpack.c.h.bf16 %v1531_v51  ;;  %v1583_v7 = vmul.f32 %v3443_v59, %v1554_v58 }
 0x1f6   : > { %v1302_v9 = vsel %vm921_vm0, %v1300_v57, %v1301_v60  ;;  %v1350_v10 = vadd.f32 %v1301_v60, %v1241_v56  ;;  %v1449_v11 = vsel %vm1063_vm1, %v1447_v61, %v1448_v62  ;;  %v1584_v12 = vmul.f32 %v3443_v59, %v1555_v63 }
 0x1f7   : > { %v1349_v14 = vadd.f32 %v1302_v9, %v1240_v52  ;;  %v1451_v15 = vsel %vm1063_vm1, %v1448_v62, %v1450_v3  ;;  %v1505_v16 = vadd.f32 %v1447_v61, %v1348_v2  ;;  %v1585_v17 = vmul.f32 %v3443_v59, %v1556_v5 }
 0x1f8   : > { %v1507_v18 = vadd.f32 %v1451_v15, %v1350_v10  ;;  %v1633_v21 = vmul.f32 %v3446_v1, %v1555_v63  ;;  %v1634_v22 = vmul.f32 %v3446_v1, %v1556_v5  ;;  %v1742_v23 = vunpack.c.l.bf16 %v1734_v8 }
 0x1f9   : > { %v1506_v25 = vadd.f32 %v1449_v11, %v1349_v14  ;;  %v1607_v26 = vadd.f32 %v1583_v7, %v1505_v16  ;;  %v1761_v27 = vmul.f32 %v3450_v13, %v1555_v63  ;;  %v1762_v28 = vmul.f32 %v3450_v13, %v1556_v5  ;;  %v1165_v14 = vld [vmem:[#allocation2 + $0x50] sm:$0x8] }
 0x1fa   : > { %v1609_v30 = vadd.f32 %v1585_v17, %v1507_v18  ;;  %v1668_v31 = vrot.slane %v1633_v21, 1  ;;  %v1669_v32 = vrot.slane %v1634_v22, 1  ;;  %v1763_v33 = vmul.f32 %v3450_v13, %v1742_v23 }
 0x1fb   : > { %v1608_v36 = vadd.f32 %v1584_v12, %v1506_v25  ;;  %v1815_v37 = vrot.slane %v1761_v27, 2  ;;  %v1816_v38 = vrot.slane %v1762_v28, 2  ;;  %v843_v39 = vunpack.c.l.bf16 %v819_v24  ;;  %v1367_v24 = vld [vmem:[#allocation2 + $0x5c] sm:$0x1] }
 0x1fc   : > { %v1670_v41 = vsel %vm921_vm0, %v1668_v31, %v1669_v32  ;;  %v1716_v43 = vadd.f32 %v1668_v31, %v1607_v26  ;;  %v1718_v44 = vadd.f32 %v1669_v32, %v1609_v30  ;;  %v1818_v45 = vrot.slane %v1763_v33, 2  ;;  %v1533_v30 = vld [vmem:[#allocation2 + $0x60] sm:$0x8]  ;;  %v1534_v31 = vld [vmem:[#allocation2 + $0x64] sm:$0xff]  }
 0x1fd   : > { %v1717_v46 = vadd.f32 %v1670_v41, %v1608_v36  ;;  %v1817_v47 = vsel %vm1063_vm1, %v1815_v37, %v1816_v38  ;;  %v844_v48 = vunpack.c.l.bf16 %v820_v34  ;;  %v845_v49 = vunpack.c.h.bf16 %v820_v34 }
 0x1fe   : > { %v1819_v50 = vsel %vm1063_vm1, %v1816_v38, %v1818_v45  ;;  %v1873_v51 = vadd.f32 %v1815_v37, %v1716_v43  ;;  %v872_v52 = vmul.f32 %v3412_v0, %v843_v39  ;;  %v1006_v53 = vunpack.c.l.bf16 %v998_v40 }
 0x1ff   : > { %v1874_v54 = vadd.f32 %v1817_v47, %v1717_v46  ;;  %v1875_v55 = vadd.f32 %v1819_v50, %v1718_v44  ;;  %v873_v56 = vmul.f32 %v3412_v0, %v844_v48  ;;  %v874_v57 = vmul.f32 %v3412_v0, %v845_v49 }
 0x200   : > { %v1904_v19 = vadd.f32 %v3463_v42, %v1873_v51  ;;  %v897_v58 = vmul.f32 %v3414_v4, %v844_v48  ;;  %v898_v60 = vmul.f32 %v3414_v4, %v845_v49  ;;  %v1027_v61 = vmul.f32 %v3416_v6, %v844_v48 }
 0x201   : > { %v1905_v62 = vadd.f32 %v3463_v42, %v1874_v54  ;;  %v1906_v63 = vadd.f32 %v3463_v42, %v1875_v55  ;;  %v1028_v2 = vmul.f32 %v3416_v6, %v845_v49  ;;  %v1029_v3 = vmul.f32 %v3416_v6, %v1006_v53  ;;  %v1166_v6 = vld [vmem:[#allocation2 + $0x54] sm:$0xff]  }
 0x202   : > { %v1928_v5 = vmax.f32 %v1904_v19, 0.0  ;;  %v934_v7 = vrot.slane %v897_v58, 1  ;;  %v935_v8 = vrot.slane %v898_v60, 1  ;;  %v1084_v0 = vrot.slane %v1027_v61, 2 }
 0x203   : > { %v1929_v9 = vmax.f32 %v1905_v62, 0.0  ;;  %v1930_v10 = vmax.f32 %v1906_v63, 0.0  ;;  %v1085_v11 = vrot.slane %v1028_v2, 2  ;;  %v1087_v12 = vrot.slane %v1029_v3, 2  ;;  %v1735_v2 = vld [vmem:[#allocation2 + $0x6c] sm:$0x1] }
 0x204   : > { %v1952_v4 = vmin.f32 %v1928_v5, 6.0  ;;  %v936_v15 = vsel %vm921_vm0, %v934_v7, %v935_v8  ;;  %v982_v16 = vadd.f32 %v934_v7, %v872_v52  ;;  %v984_v17 = vadd.f32 %v935_v8, %v874_v57 }
 0x205   : > { %v1953_v18 = vmin.f32 %v1929_v9, 6.0  ;;  %v1954_v21 = vmin.f32 %v1930_v10, 6.0  ;;  %v983_v22 = vadd.f32 %v936_v15, %v873_v56  ;;  %v1086_v23 = vsel %vm1063_vm1, %v1084_v0, %v1085_v11 }
 0x206   : > { %v2007_v25 = vrot.slane %v1952_v4, 7  ;;  %v1088_v26 = vsel %vm1063_vm1, %v1085_v11, %v1087_v12  ;;  %v1140_v27 = vadd.f32 %v1084_v0, %v982_v16  ;;  %v1189_v28 = vunpack.c.l.bf16 %v1165_v14 }
 0x207   : > { %v2008_v32 = vrot.slane %v1953_v18, 7  ;;  %v2010_v33 = vrot.slane %v1954_v21, 7  ;;  %v1141_v34 = vadd.f32 %v1086_v23, %v983_v22  ;;  %v1142_v36 = vadd.f32 %v1088_v26, %v984_v17  ;;  %v823_v21 = vld [vmem:[#allocation2 + $0x54] sm:$0xff]  }
 0x208   : > { %v1190_v37 = vunpack.c.l.bf16 %v1166_v6  ;;  %v1191_v38 = vunpack.c.h.bf16 %v1166_v6  ;;  %v1218_v39 = vmul.f32 %v3426_v20, %v1189_v28  ;;  %v1375_v40 = vunpack.c.l.bf16 %v1367_v24 }
 0x209   : > { %v2009_v41 = vsel %vm1991_vm2, %v2007_v25, %v2008_v32  ;;  %v2011_v43 = vsel %vm1991_vm2, %v2008_v32, %v2010_v33  ;;  %v1557_v44 = vunpack.c.l.bf16 %v1533_v30  ;;  %v1558_v45 = vunpack.c.l.bf16 %v1534_v31 }
 0x20a   : > { %v2051_v46 = vpack.c.bf16 %v2011_v43, %v2009_v41  ;;  %v1219_v47 = vmul.f32 %v3426_v20, %v1190_v37  ;;  %v1220_v48 = vmul.f32 %v3426_v20, %v1191_v38  ;;  %v1242_v49 = vadd.f32 %v1218_v39, %v1140_v27  ;;  %v999_v39 = vld [vmem:[#allocation2 + $0x5c] sm:$0x1]  ;;  %v3624_v43 = vld [vmem:[#allocation8 + $0x1] ss:$0 sm:$0xff] }
 0x20b   : > { %v1267_v50 = vmul.f32 %v3428_v29, %v1190_v37  ;;  %v1268_v51 = vmul.f32 %v3428_v29, %v1191_v38  ;;  %v1396_v52 = vmul.f32 %v3433_v35, %v1190_v37  ;;  %v1397_v53 = vmul.f32 %v3433_v35, %v1191_v38  ;;  %v3619_v37 = vld [vmem:[#allocation8] ss:$0 sm:$0xff] }
 0x20c   : > { %2688 = vmatmul.mubr.bf16.gmra.mxu1 %v2051_v46  ;;  %v1243_v54 = vadd.f32 %v1219_v47, %v1141_v34  ;;  %v1244_v55 = vadd.f32 %v1220_v48, %v1142_v36  ;;  %v1398_v56 = vmul.f32 %v3433_v35, %v1375_v40  ;;  %v1559_v57 = vunpack.c.h.bf16 %v1534_v31 }
 0x20d   : > { %v1303_v19 = vrot.slane %v1267_v50, 1  ;;  %v1304_v58 = vrot.slane %v1268_v51, 1  ;;  %v1452_v60 = vrot.slane %v1396_v52, 2  ;;  %v1453_v61 = vrot.slane %v1397_v53, 2  ;;  %v3630_v52 = vld [vmem:[#allocation8 + $0x2] ss:$0 sm:$0xff] }
 0x20e   : > { %v1455_v20 = vrot.slane %v1398_v56, 2  ;;  %v1586_v62 = vmul.f32 %v3443_v59, %v1557_v44  ;;  %v1587_v63 = vmul.f32 %v3443_v59, %v1558_v45  ;;  %v1588_v29 = vmul.f32 %v3443_v59, %v1559_v57  ;;  %v822_v59 = vld [vmem:[#allocation2 + $0x50] sm:$0x8] }
 0x20f   : > { %v1305_v3 = vsel %vm921_vm0, %v1303_v19, %v1304_v58  ;;  %v1351_v5 = vadd.f32 %v1303_v19, %v1242_v49  ;;  %v1353_v7 = vadd.f32 %v1304_v58, %v1244_v55  ;;  %v1454_v8 = vsel %vm1063_vm1, %v1452_v60, %v1453_v61 }
 0x210   : > { %v1352_v35 = vadd.f32 %v1305_v3, %v1243_v54  ;;  %v1456_v0 = vsel %vm1063_vm1, %v1453_v61, %v1455_v20  ;;  %v1635_v9 = vmul.f32 %v3446_v1, %v1558_v45  ;;  %v1636_v10 = vmul.f32 %v3446_v1, %v1559_v57  ;;  %v1168_v20 = vld [vmem:[#allocation2 + $0x60] sm:$0x8]  ;;  %v1169_v3 = vld [vmem:[#allocation2 + $0x64] sm:$0xff]  }
 0x211   : > { %v1508_v11 = vadd.f32 %v1452_v60, %v1351_v5  ;;  %v1510_v12 = vadd.f32 %v1456_v0, %v1353_v7  ;;  %v1743_v14 = vunpack.c.l.bf16 %v1735_v2  ;;  %v1764_v4 = vmul.f32 %v3450_v13, %v1558_v45 }
 0x212   : > { %v1509_v15 = vadd.f32 %v1454_v8, %v1352_v35  ;;  %v1671_v16 = vrot.slane %v1635_v9, 1  ;;  %v1672_v17 = vrot.slane %v1636_v10, 1  ;;  %v1765_v18 = vmul.f32 %v3450_v13, %v1559_v57 }
 0x213   : > { %v1610_v22 = vadd.f32 %v1586_v62, %v1508_v11  ;;  %v1612_v23 = vadd.f32 %v1588_v29, %v1510_v12  ;;  %v1766_v6 = vmul.f32 %v3450_v13, %v1743_v14  ;;  %v1820_v24 = vrot.slane %v1764_v4, 2 }
 0x214   : > { %v1611_v25 = vadd.f32 %v1587_v63, %v1509_v15  ;;  %v1673_v1 = vsel %vm921_vm0, %v1671_v16, %v1672_v17  ;;  %v1821_v26 = vrot.slane %v1765_v18, 2  ;;  %v846_v27 = vunpack.c.l.bf16 %v822_v59  ;;  %v1368_v59 = vld [vmem:[#allocation2 + $0x6c] sm:$0x1] }
 0x215   : > { %v1719_v28 = vadd.f32 %v1671_v16, %v1610_v22  ;;  %v1721_v30 = vadd.f32 %v1672_v17, %v1612_v23  ;;  %v1823_v31 = vrot.slane %v1766_v6, 2  ;;  %v847_v32 = vunpack.c.l.bf16 %v823_v21  ;;  %v3640_v22 = vld [vmem:[#allocation8 + $0x3] ss:$0 sm:$0xff] }
 0x216   : > { %v1720_v33 = vadd.f32 %v1673_v1, %v1611_v25  ;;  %v1822_v34 = vsel %vm1063_vm1, %v1820_v24, %v1821_v26  ;;  %v848_v36 = vunpack.c.h.bf16 %v823_v21  ;;  %v875_v38 = vmul.f32 %v3619_v37, %v846_v27 }
 0x217   : > { %v1824_v13 = vsel %vm1063_vm1, %v1821_v26, %v1823_v31  ;;  %v1876_v40 = vadd.f32 %v1820_v24, %v1719_v28  ;;  %v876_v41 = vmul.f32 %v3619_v37, %v847_v32  ;;  %v899_v44 = vmul.f32 %v3624_v43, %v847_v32  ;;  %v3644_v24 = vld [vmem:[#allocation8 + $0x4] ss:$0 sm:$0xff]  ;;  %v3649_v28 = vld [vmem:[#allocation8 + $0x5] ss:$0 sm:$0xff]  ;;  %v1536_v31 = vld [vmem:[#allocation2 + $0x70] sm:$0x8] }
 0x218   : > { %v1877_v45 = vadd.f32 %v1822_v34, %v1720_v33  ;;  %v1878_v46 = vadd.f32 %v1824_v13, %v1721_v30  ;;  %v877_v47 = vmul.f32 %v3619_v37, %v848_v36  ;;  %v900_v48 = vmul.f32 %v3624_v43, %v848_v36 }
 0x219   : > { %v1907_v49 = vadd.f32 %v3463_v42, %v1876_v40  ;;  %v937_v50 = vrot.slane %v899_v44, 1  ;;  %v1007_v51 = vunpack.c.l.bf16 %v999_v39  ;;  %v1030_v53 = vmul.f32 %v3630_v52, %v847_v32  ;;  %v1537_v32 = vld [vmem:[#allocation2 + $0x74] sm:$0xff]  }
 0x21a   : > { %v1908_v54 = vadd.f32 %v3463_v42, %v1877_v45  ;;  %v1909_v55 = vadd.f32 %v3463_v42, %v1878_v46  ;;  %v938_v56 = vrot.slane %v900_v48, 1  ;;  %v1031_v57 = vmul.f32 %v3630_v52, %v848_v36 }
 0x21b   : > { %v1931_v19 = vmax.f32 %v1907_v49, 0.0  ;;  %v985_v58 = vadd.f32 %v937_v50, %v875_v38  ;;  %v1032_v60 = vmul.f32 %v3630_v52, %v1007_v51  ;;  %v1089_v61 = vrot.slane %v1030_v53, 2 }
 0x21c   : > { %v1932_v62 = vmax.f32 %v1908_v54, 0.0  ;;  %v1933_v63 = vmax.f32 %v1909_v55, 0.0  ;;  %v939_v29 = vsel %vm921_vm0, %v937_v50, %v938_v56  ;;  %v987_v2 = vadd.f32 %v938_v56, %v877_v47  ;;  %v3656_v54 = vld [vmem:[#allocation8 + $0x6] ss:$0 sm:$0xff] }
 0x21d   : > { %v1955_v5 = vmin.f32 %v1931_v19, 6.0  ;;  %v986_v7 = vadd.f32 %v939_v29, %v876_v41  ;;  %v1090_v8 = vrot.slane %v1031_v57, 2  ;;  %v1092_v35 = vrot.slane %v1032_v60, 2  ;;  %v3660_v57 = vld [vmem:[#allocation8 + $0x7] ss:$0 sm:$0xff] }
 0x21e   : > { %v1956_v42 = vmin.f32 %v1932_v62, 6.0  ;;  %v1957_v0 = vmin.f32 %v1933_v63, 6.0  ;;  %v1143_v9 = vadd.f32 %v1089_v61, %v985_v58  ;;  %v1192_v10 = vunpack.c.l.bf16 %v1168_v20  ;;  %v1736_v58 = vld [vmem:[#allocation2 + $0x7c] sm:$0x1] }
 0x21f   : > { %v2012_v11 = vrot.slane %v1955_v5, 7  ;;  %v1091_v12 = vsel %vm1063_vm1, %v1089_v61, %v1090_v8  ;;  %v1093_v14 = vsel %vm1063_vm1, %v1090_v8, %v1092_v35  ;;  %v1193_v4 = vunpack.c.l.bf16 %v1169_v3  ;;  %v825_v5 = vld [vmem:[#allocation2 + $0x60] sm:$0x8] }
 0x220   : > { %v2013_v15 = vrot.slane %v1956_v42, 7  ;;  %v2015_v16 = vrot.slane %v1957_v0, 7  ;;  %v1144_v17 = vadd.f32 %v1091_v12, %v986_v7  ;;  %v1145_v18 = vadd.f32 %v1093_v14, %v987_v2  ;;  %v3668_v42 = vld [vmem:[#allocation8 + $0x8] ss:$0 sm:$0xff] }
 0x221   : > { %v1194_v21 = vunpack.c.h.bf16 %v1169_v3  ;;  %v1221_v23 = vmul.f32 %v3640_v22, %v1192_v10  ;;  %v1222_v6 = vmul.f32 %v3640_v22, %v1193_v4  ;;  %v1269_v25 = vmul.f32 %v3644_v24, %v1193_v4  ;;  %v826_v14 = vld [vmem:[#allocation2 + $0x64] sm:$0xff]  }
 0x222   : > { %v2014_v1 = vsel %vm1991_vm2, %v2012_v11, %v2013_v15  ;;  %v2016_v26 = vsel %vm1991_vm2, %v2013_v15, %v2015_v16  ;;  %v1376_v27 = vunpack.c.l.bf16 %v1368_v59  ;;  %v1399_v30 = vmul.f32 %v3649_v28, %v1193_v4 }
 0x223   : > { %v2052_v33 = vpack.c.bf16 %v2016_v26, %v2014_v1  ;;  %v1223_v34 = vmul.f32 %v3640_v22, %v1194_v21  ;;  %v1245_v36 = vadd.f32 %v1221_v23, %v1143_v9  ;;  %v1246_v38 = vadd.f32 %v1222_v6, %v1144_v17 }
 0x224   : > { %v1270_v39 = vmul.f32 %v3644_v24, %v1194_v21  ;;  %v1306_v13 = vrot.slane %v1269_v25, 1  ;;  %v1400_v40 = vmul.f32 %v3649_v28, %v1194_v21  ;;  %v1401_v41 = vmul.f32 %v3649_v28, %v1376_v27 }
 0x225   : > { %2691 = vmatprep.mubr.bf16.mxu1 %v2052_v33  ;;  %v1247_v44 = vadd.f32 %v1223_v34, %v1145_v18  ;;  %v1457_v45 = vrot.slane %v1399_v30, 2  ;;  %v1560_v46 = vunpack.c.l.bf16 %v1536_v31  ;;  %v1561_v47 = vunpack.c.l.bf16 %v1537_v32  ;;  %v1000_v33 = vld [vmem:[#allocation2 + $0x6c] sm:$0x1] }
 0x226   : > { %v1307_v48 = vrot.slane %v1270_v39, 1  ;;  %v1354_v49 = vadd.f32 %v1306_v13, %v1245_v36  ;;  %v1458_v50 = vrot.slane %v1400_v40, 2  ;;  %v1460_v51 = vrot.slane %v1401_v41, 2  ;;  %v3683_v41 = vld [vmem:[%s3883_s4] ss:$0 sm:$0xff] }
 0x227   : > { %v1562_v53 = vunpack.c.h.bf16 %v1537_v32  ;;  %v1589_v55 = vmul.f32 %v3656_v54, %v1560_v46  ;;  %v1590_v56 = vmul.f32 %v3656_v54, %v1561_v47  ;;  %v1637_v19 = vmul.f32 %v3660_v57, %v1561_v47 }
 0x228   : > { %v1308_v60 = vsel %vm921_vm0, %v1306_v13, %v1307_v48  ;;  %v1356_v61 = vadd.f32 %v1307_v48, %v1247_v44  ;;  %v1459_v20 = vsel %vm1063_vm1, %v1457_v45, %v1458_v50  ;;  %v1461_v62 = vsel %vm1063_vm1, %v1458_v50, %v1460_v51 }
 0x229   : > { %v1355_v63 = vadd.f32 %v1308_v60, %v1246_v38  ;;  %v1511_v29 = vadd.f32 %v1457_v45, %v1354_v49  ;;  %v1591_v2 = vmul.f32 %v3656_v54, %v1562_v53  ;;  %v1638_v3 = vmul.f32 %v3660_v57, %v1562_v53 }
 0x22a   : > { %v1513_v7 = vadd.f32 %v1461_v62, %v1356_v61  ;;  %v1674_v8 = vrot.slane %v1637_v19, 1  ;;  %v1744_v35 = vunpack.c.l.bf16 %v1736_v58  ;;  %v1767_v0 = vmul.f32 %v3668_v42, %v1561_v47 }
 0x22b   : > { %v1512_v9 = vadd.f32 %v1459_v20, %v1355_v63  ;;  %v1613_v10 = vadd.f32 %v1589_v55, %v1511_v29  ;;  %v1675_v11 = vrot.slane %v1638_v3, 1  ;;  %v1768_v12 = vmul.f32 %v3668_v42, %v1562_v53  ;;  %v1171_v29 = vld [vmem:[#allocation2 + $0x70] sm:$0x8] }
 0x22c   : > { %v1615_v4 = vadd.f32 %v1591_v2, %v1513_v7  ;;  %v1769_v59 = vmul.f32 %v3668_v42, %v1744_v35  ;;  %v1825_v15 = vrot.slane %v1767_v0, 2  ;;  %v849_v16 = vunpack.c.l.bf16 %v825_v5  ;;  %v1172_v2 = vld [vmem:[#allocation2 + $0x74] sm:$0xff]  }
 0x22d   : > { %v1614_v17 = vadd.f32 %v1590_v56, %v1512_v9  ;;  %v1676_v18 = vsel %vm921_vm0, %v1674_v8, %v1675_v11  ;;  %v1722_v21 = vadd.f32 %v1674_v8, %v1613_v10  ;;  %v1826_v23 = vrot.slane %v1768_v12, 2 }
 0x22e   : > { %v1724_v6 = vadd.f32 %v1675_v11, %v1615_v4  ;;  %v1828_v25 = vrot.slane %v1769_v59, 2  ;;  %v850_v1 = vunpack.c.l.bf16 %v826_v14  ;;  %v851_v26 = vunpack.c.h.bf16 %v826_v14  ;;  %v1369_v11 = vld [vmem:[#allocation2 + $0x7c] sm:$0x1] }
 0x22f   : > { %v1723_v27 = vadd.f32 %v1676_v18, %v1614_v17  ;;  %v1827_v30 = vsel %vm1063_vm1, %v1825_v15, %v1826_v23  ;;  %v1879_v31 = vadd.f32 %v1825_v15, %v1722_v21  ;;  %v878_v32 = vmul.f32 %v3619_v37, %v849_v16 }
 0x230   : > { %v1829_v34 = vsel %vm1063_vm1, %v1826_v23, %v1828_v25  ;;  %v879_v36 = vmul.f32 %v3619_v37, %v850_v1  ;;  %v880_v38 = vmul.f32 %v3619_v37, %v851_v26  ;;  %v901_v39 = vmul.f32 %v3624_v43, %v850_v1 }
 0x231   : > { %v1880_v13 = vadd.f32 %v1827_v30, %v1723_v27  ;;  %v1881_v40 = vadd.f32 %v1829_v34, %v1724_v6  ;;  %v1910_v44 = vadd.f32 %v3683_v41, %v1879_v31  ;;  %v902_v45 = vmul.f32 %v3624_v43, %v851_v26  ;;  %v1539_v31 = vld [vmem:[#allocation2 + $0x80] sm:$0x8] }
 0x232   : > { %v940_v46 = vrot.slane %v901_v39, 1  ;;  %v1008_v47 = vunpack.c.l.bf16 %v1000_v33  ;;  %v1033_v48 = vmul.f32 %v3630_v52, %v850_v1  ;;  %v1034_v49 = vmul.f32 %v3630_v52, %v851_v26 }
 0x233   : > { %v1911_v50 = vadd.f32 %v3683_v41, %v1880_v13  ;;  %v1912_v51 = vadd.f32 %v3683_v41, %v1881_v40  ;;  %v1934_v53 = vmax.f32 %v1910_v44, 0.0  ;;  %v941_v55 = vrot.slane %v902_v45, 1 }
 0x234   : > { %v988_v56 = vadd.f32 %v940_v46, %v878_v32  ;;  %v1035_v19 = vmul.f32 %v3630_v52, %v1008_v47  ;;  %v1094_v58 = vrot.slane %v1033_v48, 2  ;;  %v1095_v60 = vrot.slane %v1034_v49, 2  ;;  %v1540_v32 = vld [vmem:[#allocation2 + $0x84] sm:$0xff]  }
 0x235   : > { %v1935_v61 = vmax.f32 %v1911_v50, 0.0  ;;  %v1936_v20 = vmax.f32 %v1912_v51, 0.0  ;;  %v1958_v62 = vmin.f32 %v1934_v53, 6.0  ;;  %v942_v63 = vsel %vm921_vm0, %v940_v46, %v941_v55 }
 0x236   : > { %v989_v3 = vadd.f32 %v942_v63, %v879_v36  ;;  %v990_v5 = vadd.f32 %v941_v55, %v880_v38  ;;  %v1096_v7 = vsel %vm1063_vm1, %v1094_v58, %v1095_v60  ;;  %v1097_v8 = vrot.slane %v1035_v19, 2 }
 0x237   : > { %v1959_v35 = vmin.f32 %v1935_v61, 6.0  ;;  %v1960_v0 = vmin.f32 %v1936_v20, 6.0  ;;  %v2017_v9 = vrot.slane %v1958_v62, 7  ;;  %v1146_v10 = vadd.f32 %v1094_v58, %v988_v56 }
 0x238   : > { %v1098_v12 = vsel %vm1063_vm1, %v1095_v60, %v1097_v8  ;;  %v1147_v14 = vadd.f32 %v1096_v7, %v989_v3  ;;  %v1195_v4 = vunpack.c.l.bf16 %v1171_v29  ;;  %v1196_v59 = vunpack.c.l.bf16 %v1172_v2  ;;  %v1737_v60 = vld [vmem:[#allocation2 + $0x8c] sm:$0x1]  ;;  %v828_v7 = vld [vmem:[#allocation2 + $0x70] sm:$0x8] }
 0x239   : > { %v2018_v15 = vrot.slane %v1959_v35, 7  ;;  %v2020_v16 = vrot.slane %v1960_v0, 7  ;;  %v1148_v17 = vadd.f32 %v1098_v12, %v990_v5  ;;  %v1197_v18 = vunpack.c.h.bf16 %v1172_v2 }
 0x23a   : > { %v1224_v21 = vmul.f32 %v3640_v22, %v1195_v4  ;;  %v1225_v23 = vmul.f32 %v3640_v22, %v1196_v59  ;;  %v1271_v6 = vmul.f32 %v3644_v24, %v1196_v59  ;;  %v1377_v25 = vunpack.c.l.bf16 %v1369_v11 }
 0x23b   : > { %v2019_v1 = vsel %vm1991_vm2, %v2017_v9, %v2018_v15  ;;  %v2021_v26 = vsel %vm1991_vm2, %v2018_v15, %v2020_v16  ;;  %v1226_v27 = vmul.f32 %v3640_v22, %v1197_v18  ;;  %v1272_v30 = vmul.f32 %v3644_v24, %v1197_v18 }
 0x23c   : > { %v2053_v33 = vpack.c.bf16 %v2021_v26, %v2019_v1  ;;  %v1248_v34 = vadd.f32 %v1224_v21, %v1146_v10  ;;  %v1249_v36 = vadd.f32 %v1225_v23, %v1147_v14  ;;  %v1309_v38 = vrot.slane %v1271_v6, 1  ;;  %v829_v10 = vld [vmem:[#allocation2 + $0x74] sm:$0xff]  }
 0x23d   : > { %v1250_v39 = vadd.f32 %v1226_v27, %v1148_v17  ;;  %v1310_v13 = vrot.slane %v1272_v30, 1  ;;  %v1402_v40 = vmul.f32 %v3649_v28, %v1196_v59  ;;  %v1403_v44 = vmul.f32 %v3649_v28, %v1197_v18  ;;  %v1001_v30 = vld [vmem:[#allocation2 + $0x7c] sm:$0x1] }
 0x23e   : > { %2692 = vmatmul.mubr.bf16.gmra.mxu1 %v2053_v33  ;;  %v1357_v45 = vadd.f32 %v1309_v38, %v1248_v34  ;;  %v1404_v46 = vmul.f32 %v3649_v28, %v1377_v25  ;;  %v1563_v47 = vunpack.c.l.bf16 %v1539_v31  ;;  %v1564_v48 = vunpack.c.l.bf16 %v1540_v32 }
 0x23f   : > { %v1311_v49 = vsel %vm921_vm0, %v1309_v38, %v1310_v13  ;;  %v1359_v50 = vadd.f32 %v1310_v13, %v1250_v39  ;;  %v1462_v51 = vrot.slane %v1402_v40, 2  ;;  %v1463_v53 = vrot.slane %v1403_v44, 2 }
 0x240   : > { %v1358_v55 = vadd.f32 %v1311_v49, %v1249_v36  ;;  %v1465_v56 = vrot.slane %v1404_v46, 2  ;;  %v1565_v19 = vunpack.c.h.bf16 %v1540_v32  ;;  %v1592_v58 = vmul.f32 %v3656_v54, %v1563_v47 }
 0x241   : > { %v1464_v61 = vsel %vm1063_vm1, %v1462_v51, %v1463_v53  ;;  %v1514_v20 = vadd.f32 %v1462_v51, %v1357_v45  ;;  %v1593_v62 = vmul.f32 %v3656_v54, %v1564_v48  ;;  %v1639_v63 = vmul.f32 %v3660_v57, %v1564_v48 }
 0x242   : > { %v1466_v29 = vsel %vm1063_vm1, %v1463_v53, %v1465_v56  ;;  %v1515_v2 = vadd.f32 %v1464_v61, %v1358_v55  ;;  %v1594_v3 = vmul.f32 %v3656_v54, %v1565_v19  ;;  %v1640_v5 = vmul.f32 %v3660_v57, %v1565_v19  ;;  %v1174_v61 = vld [vmem:[#allocation2 + $0x80] sm:$0x8] }
 0x243   : > { %v1516_v8 = vadd.f32 %v1466_v29, %v1359_v50  ;;  %v1616_v35 = vadd.f32 %v1592_v58, %v1514_v20  ;;  %v1677_v0 = vrot.slane %v1639_v63, 1  ;;  %v1745_v9 = vunpack.c.l.bf16 %v1737_v60  ;;  %v1175_v29 = vld [vmem:[#allocation2 + $0x84] sm:$0xff]  }
 0x244   : > { %v1617_v11 = vadd.f32 %v1593_v62, %v1515_v2  ;;  %v1678_v12 = vrot.slane %v1640_v5, 1  ;;  %v1770_v14 = vmul.f32 %v3668_v42, %v1564_v48  ;;  %v1771_v4 = vmul.f32 %v3668_v42, %v1565_v19 }
 0x245   : > { %v1618_v59 = vadd.f32 %v1594_v3, %v1516_v8  ;;  %v1725_v15 = vadd.f32 %v1677_v0, %v1616_v35  ;;  %v1772_v16 = vmul.f32 %v3668_v42, %v1745_v9  ;;  %v852_v17 = vunpack.c.l.bf16 %v828_v7  ;;  %v1370_v9 = vld [vmem:[#allocation2 + $0x8c] sm:$0x1] }
 0x246   : > { %v1679_v18 = vsel %vm921_vm0, %v1677_v0, %v1678_v12  ;;  %v1830_v21 = vrot.slane %v1770_v14, 2  ;;  %v1831_v23 = vrot.slane %v1771_v4, 2  ;;  %v853_v6 = vunpack.c.l.bf16 %v829_v10 }
 0x247   : > { %v1726_v25 = vadd.f32 %v1679_v18, %v1617_v11  ;;  %v1727_v1 = vadd.f32 %v1678_v12, %v1618_v59  ;;  %v1833_v26 = vrot.slane %v1772_v16, 2  ;;  %v854_v27 = vunpack.c.h.bf16 %v829_v10 }
 0x248   : > { %v1832_v31 = vsel %vm1063_vm1, %v1830_v21, %v1831_v23  ;;  %v1882_v32 = vadd.f32 %v1830_v21, %v1725_v15  ;;  %v881_v33 = vmul.f32 %v3619_v37, %v852_v17  ;;  %v882_v34 = vmul.f32 %v3619_v37, %v853_v6 }
 0x249   : > { %v1834_v36 = vsel %vm1063_vm1, %v1831_v23, %v1833_v26  ;;  %v1883_v38 = vadd.f32 %v1832_v31, %v1726_v25  ;;  %v883_v39 = vmul.f32 %v3619_v37, %v854_v27  ;;  %v903_v13 = vmul.f32 %v3624_v43, %v853_v6 }
 0x24a   : > { %v1884_v40 = vadd.f32 %v1834_v36, %v1727_v1  ;;  %v1913_v44 = vadd.f32 %v3683_v41, %v1882_v32  ;;  %v904_v45 = vmul.f32 %v3624_v43, %v854_v27  ;;  %v1009_v46 = vunpack.c.l.bf16 %v1001_v30  ;;  %v1543_v30 = vld [vmem:[#allocation2 + $0x94] sm:$0xff]  }
 0x24b   : > { %v1914_v47 = vadd.f32 %v3683_v41, %v1883_v38  ;;  %v943_v48 = vrot.slane %v903_v13, 1  ;;  %v1036_v49 = vmul.f32 %v3630_v52, %v853_v6  ;;  %v1037_v50 = vmul.f32 %v3630_v52, %v854_v27  ;;  %v1542_v27 = vld [vmem:[#allocation2 + $0x90] sm:$0x8] }
 0x24c   : > { %v1915_v51 = vadd.f32 %v3683_v41, %v1884_v40  ;;  %v1937_v53 = vmax.f32 %v1913_v44, 0.0  ;;  %v944_v55 = vrot.slane %v904_v45, 1  ;;  %v1038_v37 = vmul.f32 %v3630_v52, %v1009_v46 }
 0x24d   : > { %v1938_v56 = vmax.f32 %v1914_v47, 0.0  ;;  %v991_v19 = vadd.f32 %v943_v48, %v881_v33  ;;  %v1099_v58 = vrot.slane %v1036_v49, 2  ;;  %v1100_v60 = vrot.slane %v1037_v50, 2 }
 0x24e   : > { %v1939_v43 = vmax.f32 %v1915_v51, 0.0  ;;  %v1961_v20 = vmin.f32 %v1937_v53, 6.0  ;;  %v945_v62 = vsel %vm921_vm0, %v943_v48, %v944_v55  ;;  %v993_v63 = vadd.f32 %v944_v55, %v883_v39  ;;  %v1738_v55 = vld [vmem:[#allocation2 + $0x9c] sm:$0x1] }
 0x24f   : > { %v1962_v2 = vmin.f32 %v1938_v56, 6.0  ;;  %v992_v3 = vadd.f32 %v945_v62, %v882_v34  ;;  %v1101_v5 = vsel %vm1063_vm1, %v1099_v58, %v1100_v60  ;;  %v1102_v7 = vrot.slane %v1038_v37, 2 }
 0x250   : > { %v1963_v8 = vmin.f32 %v1939_v43, 6.0  ;;  %v2022_v35 = vrot.slane %v1961_v20, 7  ;;  %v1149_v0 = vadd.f32 %v1099_v58, %v991_v19  ;;  %v1198_v52 = vunpack.c.l.bf16 %v1174_v61 }
 0x251   : > { %v2023_v10 = vrot.slane %v1962_v2, 7  ;;  %v1103_v11 = vsel %vm1063_vm1, %v1100_v60, %v1102_v7  ;;  %v1150_v12 = vadd.f32 %v1101_v5, %v992_v3  ;;  %v1199_v14 = vunpack.c.l.bf16 %v1175_v29 }
 0x252   : > { %v2025_v4 = vrot.slane %v1963_v8, 7  ;;  %v1151_v59 = vadd.f32 %v1103_v11, %v993_v63  ;;  %v1200_v15 = vunpack.c.h.bf16 %v1175_v29  ;;  %v1227_v16 = vmul.f32 %v3640_v22, %v1198_v52 }
 0x253   : > { %v2024_v17 = vsel %vm1991_vm2, %v2022_v35, %v2023_v10  ;;  %v1228_v18 = vmul.f32 %v3640_v22, %v1199_v14  ;;  %v1273_v21 = vmul.f32 %v3644_v24, %v1199_v14  ;;  %v1378_v23 = vunpack.c.l.bf16 %v1370_v9 }
 0x254   : > { %v2026_v6 = vsel %vm1991_vm2, %v2023_v10, %v2025_v4  ;;  %v1229_v25 = vmul.f32 %v3640_v22, %v1200_v15  ;;  %v1251_v1 = vadd.f32 %v1227_v16, %v1149_v0  ;;  %v1274_v26 = vmul.f32 %v3644_v24, %v1200_v15 }
 0x255   : > { %v2054_v31 = vpack.c.bf16 %v2026_v6, %v2024_v17  ;;  %v1252_v32 = vadd.f32 %v1228_v18, %v1150_v12  ;;  %v1312_v33 = vrot.slane %v1273_v21, 1  ;;  %v1405_v34 = vmul.f32 %v3649_v28, %v1199_v14 }
 0x256   : > { %v1253_v36 = vadd.f32 %v1229_v25, %v1151_v59  ;;  %v1313_v38 = vrot.slane %v1274_v26, 1  ;;  %v1406_v39 = vmul.f32 %v3649_v28, %v1200_v15  ;;  %v1407_v13 = vmul.f32 %v3649_v28, %v1378_v23 }
 0x257   : > { %2695 = vmatprep.mubr.bf16.mxu1 %v2054_v31  ;;  %v1360_v40 = vadd.f32 %v1312_v33, %v1251_v1  ;;  %v1467_v44 = vrot.slane %v1405_v34, 2  ;;  %v1566_v22 = vunpack.c.l.bf16 %v1542_v27  ;;  %v1567_v45 = vunpack.c.l.bf16 %v1543_v30  ;;  %v2589_v34 = vld [vmem:[%s3371_s18 + $0x8] sm:$0xff]  }
 0x258   : > { %v1314_v24 = vsel %vm921_vm0, %v1312_v33, %v1313_v38  ;;  %v1362_v46 = vadd.f32 %v1313_v38, %v1253_v36  ;;  %v1468_v47 = vrot.slane %v1406_v39, 2  ;;  %v1470_v48 = vrot.slane %v1407_v13, 2  ;;  %v2590_v33 = vld [vmem:[%s3371_s18 + $0x10] sm:$0xff]  }
 0x259   : > { %v1361_v49 = vadd.f32 %v1314_v24, %v1252_v32  ;;  %v1517_v50 = vadd.f32 %v1467_v44, %v1360_v40  ;;  %v1568_v51 = vunpack.c.h.bf16 %v1543_v30  ;;  %v1595_v53 = vmul.f32 %v3656_v54, %v1566_v22 }
 0x25a   : > { %v1469_v37 = vsel %vm1063_vm1, %v1467_v44, %v1468_v47  ;;  %v1471_v28 = vsel %vm1063_vm1, %v1468_v47, %v1470_v48  ;;  %v1596_v56 = vmul.f32 %v3656_v54, %v1567_v45  ;;  %v1641_v19 = vmul.f32 %v3660_v57, %v1567_v45 }
 0x25b   : > { %v1518_v58 = vadd.f32 %v1469_v37, %v1361_v49  ;;  %v1519_v60 = vadd.f32 %v1471_v28, %v1362_v46  ;;  %v1597_v61 = vmul.f32 %v3656_v54, %v1568_v51  ;;  %v1619_v43 = vadd.f32 %v1595_v53, %v1517_v50  ;;  %v2591_v37 = vld [vmem:[%s3371_s18 + $0x18] sm:$0xff]  }
 0x25c   : > { %v1642_v20 = vmul.f32 %v3660_v57, %v1568_v51  ;;  %v1680_v62 = vrot.slane %v1641_v19, 1  ;;  %v1746_v63 = vunpack.c.l.bf16 %v1738_v55  ;;  %v1773_v29 = vmul.f32 %v3668_v42, %v1567_v45  ;;  %v2592_v55 = vld [vmem:[%s3371_s18 + $0x20] sm:$0xff]  }
 0x25d   : > { %v1620_v2 = vadd.f32 %v1596_v56, %v1518_v58  ;;  %v1621_v3 = vadd.f32 %v1597_v61, %v1519_v60  ;;  %v1774_v5 = vmul.f32 %v3668_v42, %v1568_v51  ;;  %v2563_v36 = vunpack.c.l.bf16 %v2590_v33 }
 0x25e   : > { %v1681_v7 = vrot.slane %v1642_v20, 1  ;;  %v1728_v8 = vadd.f32 %v1680_v62, %v1619_v43  ;;  %v1775_v35 = vmul.f32 %v3668_v42, %v1746_v63  ;;  %v1835_v0 = vrot.slane %v1773_v29, 2 }
 0x25f   : > { %v1836_v52 = vrot.slane %v1774_v5, 2  ;;  %v2559_v13 = vunpack.c.l.bf16 %v2589_v34  ;;  %v2564_v45 = vunpack.c.h.bf16 %v2590_v33  ;;  %v2560_v48 = vunpack.c.h.bf16 %v2589_v34 }
 0x260   : > { %v1682_v9 = vsel %vm921_vm0, %v1680_v62, %v1681_v7  ;;  %v1730_v54 = vadd.f32 %v1681_v7, %v1621_v3  ;;  %v1838_v10 = vrot.slane %v1775_v35, 2  ;;  %v1885_v11 = vadd.f32 %v1835_v0, %v1728_v8  ;;  %v2594_v35 = vld [vmem:[%s3371_s18 + $0x30] sm:$0xff]  }
 0x261   : > { %v1729_v57 = vadd.f32 %v1682_v9, %v1620_v2  ;;  %v1837_v12 = vsel %vm1063_vm1, %v1835_v0, %v1836_v52  ;;  %v2571_v28 = vunpack.c.l.bf16 %v2592_v55  ;;  %v2567_v58 = vunpack.c.l.bf16 %v2591_v37  ;;  %v2593_v0 = vld [vmem:[%s3371_s18 + $0x28] sm:$0xff]  }
 0x262   : > { %v1839_v14 = vsel %vm1063_vm1, %v1836_v52, %v1838_v10  ;;  %v1916_v4 = vadd.f32 %v3683_v41, %v1885_v11  ;;  %v2572_v20 = vunpack.c.h.bf16 %v2592_v55  ;;  %v2568_v2 = vunpack.c.h.bf16 %v2591_v37 }
 0x263   : > { %v1886_v59 = vadd.f32 %v1837_v12, %v1729_v57  ;;  %v1887_v15 = vadd.f32 %v1839_v14, %v1730_v54  ;;  %v2579_v52 = vunpack.c.l.bf16 %v2594_v35  ;;  %v2575_v10 = vunpack.c.l.bf16 %v2593_v0 }
 0x264   : > { %v1940_v16 = vmax.f32 %v1916_v4, 0.0  ;;  %v2580_v14 = vunpack.c.h.bf16 %v2594_v35 }
 0x265   : > { %v1917_v42 = vadd.f32 %v3683_v41, %v1886_v59  ;;  %v1918_v17 = vadd.f32 %v3683_v41, %v1887_v15  ;;  %v3766_v41 = vld [vmem:[%s3885_s6] ss:$0 sm:$0xff] }
 0x266   : > { %v1964_v18 = vmin.f32 %v1940_v16, 6.0  ;;  %v2576_v16 = vunpack.c.h.bf16 %v2593_v0 }
 0x267   : > { %v1941_v21 = vmax.f32 %v1917_v42, 0.0  ;;  %v1942_v23 = vmax.f32 %v1918_v17, 0.0 }
 0x268   : > { %v2027_v1 = vrot.slane %v1964_v18, 7 }
 0x269   : > { %v1965_v6 = vmin.f32 %v1941_v21, 6.0  ;;  %v1966_v25 = vmin.f32 %v1942_v23, 6.0  ;;  %v2596_v23 = vld [vmem:[%s3371_s18 + $0x40] sm:$0xff]  }
 0x26a   : > { %v2588_v33 = vunpack.c.h.bf16 %v2596_v23 }
 0x26b   : > { %v2028_v26 = vrot.slane %v1965_v6, 7  ;;  %v2030_v27 = vrot.slane %v1966_v25, 7  ;;  %v2595_v6 = vld [vmem:[%s3371_s18 + $0x38] sm:$0xff]   ;;  %v2587_v25 = vunpack.c.l.bf16 %v2596_v23 }
 0x26d   : > { %v2029_v30 = vsel %vm1991_vm2, %v2027_v1, %v2028_v26  ;;  %v2031_v31 = vsel %vm1991_vm2, %v2028_v26, %v2030_v27  ;;  %v2583_v27 = vunpack.c.l.bf16 %v2595_v6 }
 0x26e   : > { %v2055_v32 = vpack.c.bf16 %v2031_v31, %v2029_v30 }
 0x270   : > { %2696 = vmatmul.mubr.bf16.gmra.mxu1 %v2055_v32 }
 0x29c   : > { %v2685_v38 = vpop.f32.mrf.mxu1 }
 0x29d   : > { %v2170_v39 = vadd.f32 %v2685_v38, %v3766_v41 }
 0x29e   : > { %v2161_v40 = vpop.f32.mrf.mxu1 }
 0x29f   : > { %v2262_v44 = vadd.f32 %v2563_v36, %v2170_v39  ;;  %v2162_v22 = vadd.f32 %v3766_v41, %v2161_v40  ;;  %v2584_v39 = vunpack.c.h.bf16 %v2595_v6 }
 0x2a0   : > { %v2686_v24 = vpop.f32.mrf.mxu1 }
 0x2a1   : > { %2278 = vst [vmem:[%s3365_s17 + $0x10] sm:$0xff] %v2262_v44  ;;  %v2260_v46 = vadd.f32 %v2559_v13, %v2162_v22  ;;  %v2173_v47 = vadd.f32 %v2686_v24, %v3766_v41 }
 0x2a2   : > { %v2164_v49 = vpop.f32.mrf.mxu1 }
 0x2a3   : > { %2276 = vst [vmem:[%s3365_s17] sm:$0xff] %v2260_v46  ;;  %v2263_v50 = vadd.f32 %v2564_v45, %v2173_v47  ;;  %v2165_v51 = vadd.f32 %v3766_v41, %v2164_v49 }
 0x2a5   : > { %2279 = vst [vmem:[%s3365_s17 + $0x18] sm:$0xff] %v2263_v50  ;;  %v2261_v53 = vadd.f32 %v2560_v48, %v2165_v51 }
 0x2a7   : > { %2277 = vst [vmem:[%s3365_s17 + $0x8] sm:$0xff] %v2261_v53 }
 0x2cc   : > { %v2689_v56 = vpop.f32.mrf.mxu1 }
 0x2cd   : > { %v2186_v19 = vadd.f32 %v2689_v56, %v3766_v41 }
 0x2ce   : > { %v2177_v60 = vpop.f32.mrf.mxu1 }
 0x2cf   : > { %v2266_v61 = vadd.f32 %v2571_v28, %v2186_v19  ;;  %v2178_v43 = vadd.f32 %v3766_v41, %v2177_v60 }
 0x2d0   : > { %v2690_v62 = vpop.f32.mrf.mxu1 }
 0x2d1   : > { %2282 = vst [vmem:[%s3365_s17 + $0x30] sm:$0xff] %v2266_v61  ;;  %v2264_v63 = vadd.f32 %v2567_v58, %v2178_v43  ;;  %v2189_v29 = vadd.f32 %v2690_v62, %v3766_v41 }
 0x2d2   : > { %v2180_v3 = vpop.f32.mrf.mxu1 }
 0x2d3   : > { %2280 = vst [vmem:[%s3365_s17 + $0x20] sm:$0xff] %v2264_v63  ;;  %v2267_v5 = vadd.f32 %v2572_v20, %v2189_v29  ;;  %v2181_v7 = vadd.f32 %v3766_v41, %v2180_v3 }
 0x2d5   : > { %2283 = vst [vmem:[%s3365_s17 + $0x38] sm:$0xff] %v2267_v5  ;;  %v2265_v8 = vadd.f32 %v2568_v2, %v2181_v7 }
 0x2d7   : > { %2281 = vst [vmem:[%s3365_s17 + $0x28] sm:$0xff] %v2265_v8 }
 0x2fe   : > { %v2693_v9 = vpop.f32.mrf.mxu1 }
 0x2ff   : > { %v2202_v54 = vadd.f32 %v2693_v9, %v3766_v41 }
 0x300   : > { %v2193_v11 = vpop.f32.mrf.mxu1 }
 0x301   : > { %v2270_v57 = vadd.f32 %v2579_v52, %v2202_v54  ;;  %v2194_v12 = vadd.f32 %v3766_v41, %v2193_v11 }
 0x302   : > { %v2694_v4 = vpop.f32.mrf.mxu1 }
 0x303   : > { %2286 = vst [vmem:[%s3365_s17 + $0x50] sm:$0xff] %v2270_v57  ;;  %v2268_v59 = vadd.f32 %v2575_v10, %v2194_v12  ;;  %v2205_v15 = vadd.f32 %v2694_v4, %v3766_v41 }
 0x304   : > { %v2196_v42 = vpop.f32.mrf.mxu1 }
 0x305   : > { %2284 = vst [vmem:[%s3365_s17 + $0x40] sm:$0xff] %v2268_v59  ;;  %v2271_v17 = vadd.f32 %v2580_v14, %v2205_v15  ;;  %v2197_v18 = vadd.f32 %v3766_v41, %v2196_v42 }
 0x307   : > { %2287 = vst [vmem:[%s3365_s17 + $0x58] sm:$0xff] %v2271_v17  ;;  %v2269_v21 = vadd.f32 %v2576_v16, %v2197_v18 }
 0x309   : > { %2285 = vst [vmem:[%s3365_s17 + $0x48] sm:$0xff] %v2269_v21 }
 0x330   : > { %v2697_v1 = vpop.f32.mrf.mxu1 }
 0x331   : > { %v2218_v26 = vadd.f32 %v2697_v1, %v3766_v41 }
 0x332   : > { %v2209_v30 = vpop.f32.mrf.mxu1 }
 0x333   : > { %v2274_v31 = vadd.f32 %v2587_v25, %v2218_v26  ;;  %v2210_v32 = vadd.f32 %v3766_v41, %v2209_v30 }
 0x334   : > { %v2698_v34 = vpop.f32.mrf.mxu1 }
 0x335   : > { %2290 = vst [vmem:[%s3365_s17 + $0x70] sm:$0xff] %v2274_v31  ;;  %v2272_v36 = vadd.f32 %v2583_v27, %v2210_v32  ;;  %v2221_v38 = vadd.f32 %v2698_v34, %v3766_v41 }
 0x336   : > { %v2212_v13 = vpop.f32.mrf.mxu1 }
 0x337   : > { %2288 = vst [vmem:[%s3365_s17 + $0x60] sm:$0xff] %v2272_v36  ;;  %v2275_v40 = vadd.f32 %v2588_v33, %v2221_v38  ;;  %v2213_v44 = vadd.f32 %v3766_v41, %v2212_v13 }
 0x339   : > { %2291 = vst [vmem:[%s3365_s17 + $0x78] sm:$0xff] %v2275_v40  ;;  %v2273_v22 = vadd.f32 %v2584_v39, %v2213_v44 }
 0x33b   : > { %2289 = vst [vmem:[%s3365_s17 + $0x68] sm:$0xff] %v2273_v22 }
 0x33c   : > { %2999 = shalt.err (!%p2996_p4)
}
 0x33d   : > { %s3000_s8 = scalar_lea.hbm %s3811_s20, 2048  ;;  %s3004_s23 = scalar_lea.hbm %s3926_s22, 8192 }
 0x33e   : > { %p3001_p5 = scmp.ne.s32.totalorder %s3811_s20, %s3000_s8  ;;  %p3005_p3 = scmp.lt.s32.totalorder %s3811_s20, %s3926_s22 }
 0x33f   : > { %p3006_p1 = scmp.lt.s32.totalorder %s3004_s23, %s3000_s8 }
 0x340   : > { %p3002_p8 = pnand %p3001_p5, %p3927_p11 }
 0x341   : > { %p3007_p7 = por %p3006_p1, %p3005_p3 }
 0x342   : > { %p3003_p10 = pneg %p3002_p8 }
 0x344   : > { %p3008_p9 = pnand %p3007_p7, %p3003_p10 }
 0x346   : > { %3011 = shalt.err (!%p3008_p9)
}
 0x347   : > { %s3128_s16 = smov 128   ;;  %s3129_s18 = smov 8  }
 0x348   : > { %2716 = dma.vmem_to_hbm [thread:$0]  (%p3927_p11), %s3813_s14, 2048, %s3811_s20, %s3819_s3, %s3128_s16, %s3128_s16, %s3129_s18  }
 0x349 PF: > { %s3928_s24 = sld [smem:[#allocation16_spill]]  ;;  %p2743_p6 = scmp.ge.s32.totalorder %s3114_s11, 2 }
 0x34a   : > { %s3929_s27 = sld [smem:[#allocation20_spill]] }
 0x34f   : > { %s2324_s5 = sand.u32 1, %s3928_s24  }
 0x350   : > { %p3930_p13 = scmp.ne.s32.totalorder %s3929_s27, 0  ;;  %s2325_s9 = scalar_lea.sflag [#allocation5], %s2324_s5 }
 0x352   : > { %p2733_p12 = pnand %p2743_p6, %p3930_p13 }
 0x354   : > { %p2734_p0 = pneg %p2733_p12 }
 0x356   : > { %3069 = dma.done.wait (%p2734_p0), %s2325_s9, 2048  }
 0x357   : > { %3071 = vsyncadd (%p2734_p0), %s2325_s9, 4294965248  ;;  %s25_s11 = sadd.s32 1, %s3114_s11   ;;  %s3931_s30 = sld [smem:[#allocation18_spill]] }
 0x358   : > { %p22_p2 = scmp.ge.s32.totalorder %s25_s11, 6   ;;  %s3932_s9 = sld [smem:[#allocation21_spill]] }
 0x359   : > { %s3933_s14 = sld [smem:[#allocation22_spill]]  ;;  %s3934_s24 = smov %s3078_s25 }
 0x35a   : > { %s3935_s25 = smov %s3082_s26  ;;  %s3936_s26 = smov %s3323_s1 }
 0x35b   : > { %s3937_s27 = smov %s3090_s28  ;;  %s3938_s28 = smov %s3094_s29 }
 0x35c   : > { %s3939_s29 = smov %s3318_s13  ;;  %s3940_s8 = smov %s3110_s10 }
 0x35d   :  { %24 = sbr.rel (!%p22_p2) target bundleno = 16 (0x10), region = 122 }
 0x35f   : > { %s3941_s10 = smov %s3933_s14 }
 0x362   :  { %2330 = vsyncpa [#allocation4], 1 }
 0x363   :  { %2332 = vsyncpa [#allocation4 + $0x1], 1 }
 0x364   :  { %2333 = vsyncpa [#allocation7], 1 }
 0x365   :  { %2334 = vsyncpa [#allocation10], 1 }
 0x366   :  { %2335 = vsyncpa [#allocation5], 1 }
 0x367   :  { %2337 = vsyncpa [#allocation5 + $0x1], 1 }

</bundles_post_ra>
